<compile_context>
chip_gen: v7x
topology: tpu7x:2x2x1
jax: 0.10.0
libtpu: 0.0.40
codegen_flags: <defaults>
</compile_context>

<pallas_src>
import functools
import math

import jax
import jax.numpy as jnp
from jax.experimental import pallas as pl
from jax.experimental.pallas import tpu as pltpu


# ----------------------------------------------------------------------------
# In-kernel helpers
# ----------------------------------------------------------------------------

def _shift_rows(x, off):
    """y[r] = x[r + off] along axis 0 (static off), zero-filled out of range."""
    if off == 0:
        return x
    _, c = x.shape
    pad = jnp.zeros((abs(off), c), x.dtype)
    if off > 0:
        return jnp.concatenate([x[off:, :], pad], axis=0)
    return jnp.concatenate([pad, x[:off, :]], axis=0)


def _conv3x3_im2col(x, w, b, *, H, W, rows, cols, relu):
    """3x3 'same' conv on a row-flattened NHWC tile via ONE im2col matmul.

    x:    (H*W, Cin) rows (row index = h*W + w, lanes = channels)
    w:    (9*Cin, Cout)  -- (ky, kx, cin) row-major flatten of HWIO weights
    b:    (1, Cout)
    rows: (H*W, 1) int32 flattened row index;  cols: (H*W, 1) int32 = w index
    """
    taps = []
    for ky in range(3):
        for kx in range(3):
            dy, dx = ky - 1, kx - 1
            if dy == 0 and dx == 0:
                taps.append(x)
                continue
            shifted = _shift_rows(x, dy * W + dx)
            # validity mask for the halo (replaces host-side zero padding)
            valid_h = None
            if dy < 0:
                valid_h = rows >= (-dy) * W
            elif dy > 0:
                valid_h = rows < (H - dy) * W
            valid_w = None
            if dx < 0:
                valid_w = cols >= -dx
            elif dx > 0:
                valid_w = cols < (W - dx)
            if valid_h is None:
                valid = valid_w
            elif valid_w is None:
                valid = valid_h
            else:
                valid = valid_h & valid_w
            taps.append(jnp.where(valid, shifted, 0.0))
    patches = jnp.concatenate(taps, axis=-1)                 # (H*W, 9*Cin)
    y = jnp.dot(patches, w, preferred_element_type=jnp.float32) + b
    if relu:
        y = jnp.maximum(y, 0.0)
    return y


# ----------------------------------------------------------------------------
# Fused flow kernel: K x (ActNorm -> 1x1 conv -> affine coupling) + prior
# ----------------------------------------------------------------------------

def _flow_kernel(x_ref, an_b_ref, an_s_ref, invw_ref,
                 w1_ref, b1_ref, w2_ref, b2_ref, w3_ref, b3_ref,
                 z_out_ref, stats_ref,
                 ld_acc, *, H, W):
    k = pl.program_id(1)
    n_steps = pl.num_programs(1)
    C = x_ref.shape[-1]
    C2 = C // 2

    # z lives in the output block (same block index for every k -> VMEM
    # resident across the K steps; HBM writeback only when the batch changes).
    @pl.when(k == 0)
    def _init():
        z_out_ref[0] = x_ref[0]
        ld_acc[...] = jnp.zeros_like(ld_acc)

    # spatial coordinates of every flattened (h, w) row — shared by both convs
    rows = jax.lax.broadcasted_iota(jnp.int32, (H * W, 1), 0)
    if (W & (W - 1)) == 0:
        cols = jnp.bitwise_and(rows, W - 1)
    else:
        cols = rows % W

    z = z_out_ref[0]                                         # (H*W, C)

    # --- ActNorm + Invert1x1Conv (fused: one elementwise, one MXU matmul) ---
    y = (z + an_b_ref[0]) * an_s_ref[0]
    y = jnp.dot(y, invw_ref[0], preferred_element_type=jnp.float32)

    z1 = y[:, :C2]
    z2 = y[:, C2:]

    # --- coupling NN: conv3x3 -> relu -> conv1x1 -> relu -> conv3x3 ---------
    h1 = _conv3x3_im2col(z1, w1_ref[0], b1_ref[0],
                         H=H, W=W, rows=rows, cols=cols, relu=True)
    h2 = jnp.dot(h1, w2_ref[0], preferred_element_type=jnp.float32) + b2_ref[0]
    h2 = jnp.maximum(h2, 0.0)
    h3 = _conv3x3_im2col(h2, w3_ref[0], b3_ref[0],
                         H=H, W=W, rows=rows, cols=cols, relu=False)

    # --- affine coupling combine (fused, no HBM round-trip) -----------------
    shift = h3[:, :C2]
    a = h3[:, C2:] + 2.0
    scale = jax.nn.sigmoid(a)
    # numerically-stable log(sigmoid(a)) = -softplus(-a)
    log_scale = -(jnp.maximum(-a, 0.0) + jnp.log(1.0 + jnp.exp(-jnp.abs(a))))
    z2n = (z2 + shift) * scale

    z_new = jnp.concatenate([z1, z2n], axis=-1)              # (H*W, C)
    z_out_ref[0] = z_new
    ld_step = jnp.sum(jnp.sum(log_scale, axis=1, keepdims=True),
                      axis=0, keepdims=True)                 # (1, 1)
    ld_acc[...] = ld_acc[...] + ld_step

    # --- last flow step: standard-normal log p(z) + coupling logdet ---------
    @pl.when(k == n_steps - 1)
    def _finalize():
        ssq = jnp.sum(jnp.sum(z_new * z_new, axis=1, keepdims=True),
                      axis=0, keepdims=True)                 # (1, 1)
        logpz = -0.5 * ssq - 0.5 * (H * W * C) * math.log(2.0 * math.pi)
        stats_ref[0] = jnp.concatenate(
            [jnp.broadcast_to(ld_acc[...], (1, 128)),
             jnp.broadcast_to(logpz, (1, 128))], axis=0)


def _fused_flow_call(x_rows, p, H, W):
    B, HW, C = x_rows.shape
    K = p["an_bias"].shape[0]
    C2 = C // 2
    F = p["w1"].shape[-1]

    kern = functools.partial(_flow_kernel, H=H, W=W)
    z_rows, stats = pl.pallas_call(
        kern,
        out_shape=(jax.ShapeDtypeStruct((B, HW, C), jnp.float32),
                   jax.ShapeDtypeStruct((B, 2, 128), jnp.float32)),
        grid_spec=pltpu.PrefetchScalarGridSpec(
            num_scalar_prefetch=0,
            grid=(B, K),
            in_specs=[
                pl.BlockSpec((1, HW, C), lambda b, k: (b, 0, 0)),      # x rows
                pl.BlockSpec((1, 1, C), lambda b, k: (k, 0, 0)),       # an_bias
                pl.BlockSpec((1, 1, C), lambda b, k: (k, 0, 0)),       # exp(logs)
                pl.BlockSpec((1, C, C), lambda b, k: (k, 0, 0)),       # inv_w
                pl.BlockSpec((1, 9 * C2, F), lambda b, k: (k, 0, 0)),  # w1
                pl.BlockSpec((1, 1, F), lambda b, k: (k, 0, 0)),       # b1
                pl.BlockSpec((1, F, F), lambda b, k: (k, 0, 0)),       # w2
                pl.BlockSpec((1, 1, F), lambda b, k: (k, 0, 0)),       # b2
                pl.BlockSpec((1, 9 * F, C), lambda b, k: (k, 0, 0)),   # w3
                pl.BlockSpec((1, 1, C), lambda b, k: (k, 0, 0)),       # b3
            ],
            out_specs=(
                pl.BlockSpec((1, HW, C), lambda b, k: (b, 0, 0)),      # z
                pl.BlockSpec((1, 2, 128), lambda b, k: (b, 0, 0)),     # stats
            ),
            scratch_shapes=[
                pltpu.VMEM((1, 1), jnp.float32),    # coupling-logdet accumulator
            ],
        ),
        compiler_params=pltpu.CompilerParams(
            dimension_semantics=("parallel", "arbitrary")),
    )(x_rows,
      p["an_bias"], p["an_scale"], p["inv_w"],
      p["w1"], p["b1"], p["w2"], p["b2"], p["w3"], p["b3"])
    return z_rows, stats


# ----------------------------------------------------------------------------
# Plain-JAX glue (reshapes, parameter bookkeeping)
# ----------------------------------------------------------------------------

def squeeze2(x):
    # modules.SqueezeTS(factor=2): (B, C, H, W) -> (B, 4C, H/2, W/2)
    B, C, H, W = x.shape
    x = x.reshape(B, C, H // 2, 2, W // 2, 2)
    x = x.transpose(0, 1, 3, 5, 2, 4)
    return x.reshape(B, C * 4, H // 2, W // 2)


def pack_params(params, H, W):
    """Stack per-step weights for grid indexing; precompute exp(logs) and the
    data-independent logdet constant (slogdet) OFF the forward critical path."""
    K = len(params)
    C = params[0]["an_bias"].shape[0]
    C2 = C // 2
    F = params[0]["w1"].shape[-1]
    stack = lambda name: jnp.stack([p[name] for p in params], axis=0)

    packed = {
        "an_bias": stack("an_bias").reshape(K, 1, C),
        "an_scale": jnp.exp(stack("an_logs")).reshape(K, 1, C),
        "inv_w": stack("inv_w"),                                 # (K, C, C)
        "w1": stack("w1").reshape(K, 9 * C2, F),
        "b1": stack("b1").reshape(K, 1, F),
        "w2": stack("w2"),                                       # (K, F, F)
        "b2": stack("b2").reshape(K, 1, F),
        "w3": stack("w3").reshape(K, 9 * F, C),
        "b3": stack("b3").reshape(K, 1, C),
    }
    # data-independent logdet: H*W*(sum(logs) + log|det W|) per step.
    # (slogdet sign intentionally discarded: the flow uses log|det|.)
    ld_const = 0.0
    for p in params:
        ld_const = ld_const + H * W * jnp.sum(p["an_logs"])
        ld_const = ld_const + H * W * jnp.linalg.slogdet(p["inv_w"])[1]
    packed["logdet_const"] = jnp.asarray(ld_const, jnp.float32)
    return packed


def norm_flow_net_forward(x, packed):
    # x: (B, C, T=lag_len, H, W) NCTHW, forward (reverse=False) path, L=1.
    B, C_in, T, H, W = x.shape
    Hs, Ws, C = H // 2, W // 2, 4 * C_in

    # level 0: SqueezeTS on time slice 0 (reference loop only ever writes t=0)
    zsq = squeeze2(x[:, :, 0])                                   # (B, 4C, H/2, W/2)
    x_rows = zsq.transpose(0, 2, 3, 1).reshape(B, Hs * Ws, C)    # NHWC rows

    z_rows, stats = _fused_flow_call(x_rows, packed, Hs, Ws)

    logdet = packed["logdet_const"] + stats[:, 0, 0]
    logpz = stats[:, 1, 0]
    z = z_rows.reshape(B, Hs, Ws, C).transpose(0, 3, 1, 2)[:, :, None]
    state = None
    return z, state, logdet, logpz


def make_params(key, K, C, filter_size):
    C2 = C // 2
    params = []
    for _ in range(K):
        key, k0, k1, k2, k3, k4, k5 = jax.random.split(key, 7)
        wq = jax.random.normal(k2, (C, C), jnp.float32)
        inv_w, _ = jnp.linalg.qr(wq)                   # invertible (orthogonal) init
        params.append(dict(
            an_logs=0.05 * jax.random.normal(k0, (C,), jnp.float32),
            an_bias=0.05 * jax.random.normal(k1, (C,), jnp.float32),
            inv_w=inv_w,
            w1=0.05 * jax.random.normal(k3, (3, 3, C2, filter_size), jnp.float32),
            b1=jnp.zeros((filter_size,), jnp.float32),
            w2=0.05 * jax.random.normal(k4, (filter_size, filter_size), jnp.float32),
            b2=jnp.zeros((filter_size,), jnp.float32),
            w3=0.01 * jax.random.normal(k5, (3, 3, filter_size, C), jnp.float32),
            b3=jnp.zeros((C,), jnp.float32),
        ))
    return params


if __name__ == "__main__":
    key = jax.random.PRNGKey(0)
    B, C, T, H, W = 2, 4, 1, 16, 16        # bsz=2, input_shape=(4,16,16), lag_len=1
    K, filter_size = 2, 32                  # L=1 level, K=2 flow steps

    kx, kp = jax.random.split(key)
    x = jax.random.normal(kx, (B, C, T, H, W), jnp.float32)
    params = make_params(kp, K, C * 4, filter_size)
    packed = pack_params(params, H // 2, W // 2)   # constants computed once, off hot path

    fwd = jax.jit(norm_flow_net_forward)
    z, state, logdet, logpz = fwd(x, packed)
    jax.block_until_ready((z, logdet, logpz))

    assert z.shape == (B, C * 4, 1, H // 2, W // 2)
    assert logdet.shape == (B,) and logpz.shape == (B,)
    print("KERNEL_OK")
</pallas_src>

<mosaic_0001>
module attributes {stable_mosaic.version = 11 : i64} {
  func.func @_flow_kernel(%arg0: i32, %arg1: i32, %arg2: memref<1x64x16xf32, #tpu.memory_space<vmem>>, %arg3: memref<1x1x16xf32, #tpu.memory_space<vmem>>, %arg4: memref<1x1x16xf32, #tpu.memory_space<vmem>>, %arg5: memref<1x16x16xf32, #tpu.memory_space<vmem>>, %arg6: memref<1x72x32xf32, #tpu.memory_space<vmem>>, %arg7: memref<1x1x32xf32, #tpu.memory_space<vmem>>, %arg8: memref<1x32x32xf32, #tpu.memory_space<vmem>>, %arg9: memref<1x1x32xf32, #tpu.memory_space<vmem>>, %arg10: memref<1x288x16xf32, #tpu.memory_space<vmem>>, %arg11: memref<1x1x16xf32, #tpu.memory_space<vmem>>, %arg12: memref<1x64x16xf32, #tpu.memory_space<vmem>>, %arg13: memref<1x2x128xf32, #tpu.memory_space<vmem>>, %arg14: memref<1x1xf32, #tpu.memory_space<vmem>>) attributes {dimension_semantics = [#tpu.dimension_semantics<parallel>, #tpu.dimension_semantics<arbitrary>], iteration_bounds = array<i64: 2, 2>, scalar_prefetch = 0 : i64, scratch_operands = 1 : i64, tpu.core_type = #tpu.core_type<tc>, window_params = [{transform_indices = @transform_0, window_bounds = array<i64: 1, 64, 16>}, {transform_indices = @transform_1, window_bounds = array<i64: 1, 1, 16>}, {transform_indices = @transform_2, window_bounds = array<i64: 1, 1, 16>}, {transform_indices = @transform_3, window_bounds = array<i64: 1, 16, 16>}, {transform_indices = @transform_4, window_bounds = array<i64: 1, 72, 32>}, {transform_indices = @transform_5, window_bounds = array<i64: 1, 1, 32>}, {transform_indices = @transform_6, window_bounds = array<i64: 1, 32, 32>}, {transform_indices = @transform_7, window_bounds = array<i64: 1, 1, 32>}, {transform_indices = @transform_8, window_bounds = array<i64: 1, 288, 16>}, {transform_indices = @transform_9, window_bounds = array<i64: 1, 1, 16>}, {transform_indices = @transform_10, window_bounds = array<i64: 1, 64, 16>}, {transform_indices = @transform_11, window_bounds = array<i64: 1, 2, 128>}]} {
    %c0_i32 = arith.constant 0 : i32
    %0 = arith.cmpi eq, %arg1, %c0_i32 : i32
    %1 = arith.extui %0 : i1 to i32
    %c0_i32_0 = arith.constant 0 : i32
    %2 = arith.cmpi ne, %1, %c0_i32_0 : i32
    scf.if %2 {
      %c0_106 = arith.constant 0 : index
      %c0_107 = arith.constant 0 : index
      %c0_108 = arith.constant 0 : index
      %255 = vector.load %arg2[%c0_106, %c0_107, %c0_108] : memref<1x64x16xf32, #tpu.memory_space<vmem>>, vector<1x64x16xf32>
      %256 = vector.shape_cast %255 : vector<1x64x16xf32> to vector<64x16xf32>
      %c0_109 = arith.constant 0 : index
      %c0_110 = arith.constant 0 : index
      %c0_111 = arith.constant 0 : index
      %257 = vector.load %arg12[%c0_109, %c0_110, %c0_111] : memref<1x64x16xf32, #tpu.memory_space<vmem>>, vector<1x64x16xf32>
      %258 = vector.shape_cast %257 : vector<1x64x16xf32> to vector<64x16xf32>
      %259 = vector.shape_cast %256 : vector<64x16xf32> to vector<1x64x16xf32>
      tpu.vector_store %arg12[%c0_109, %c0_110, %c0_111], %259 {strides = array<i32>} : memref<1x64x16xf32, #tpu.memory_space<vmem>>, vector<1x64x16xf32>,
      %cst_112 = arith.constant 0.000000e+00 : f32
      %260 = vector.broadcast %cst_112 : f32 to vector<1x1xf32>
      %c0_113 = arith.constant 0 : index
      %c0_114 = arith.constant 0 : index
      %261 = vector.load %arg14[%c0_113, %c0_114] : memref<1x1xf32, #tpu.memory_space<vmem>>, vector<1x1xf32>
      tpu.vector_store %arg14[%c0_113, %c0_114], %260 {strides = array<i32>} : memref<1x1xf32, #tpu.memory_space<vmem>>, vector<1x1xf32>,
    } else {
    }
    %3 = tpu.iota {dimensions = array<i32: 0>} : vector<64x1xi32>
    %c7_i32 = arith.constant 7 : i32
    %4 = vector.broadcast %c7_i32 : i32 to vector<64x1xi32>
    %5 = arith.andi %3, %4 : vector<64x1xi32>
    %c0 = arith.constant 0 : index
    %c0_1 = arith.constant 0 : index
    %c0_2 = arith.constant 0 : index
    %6 = vector.load %arg12[%c0, %c0_1, %c0_2] : memref<1x64x16xf32, #tpu.memory_space<vmem>>, vector<1x64x16xf32>
    %7 = vector.shape_cast %6 : vector<1x64x16xf32> to vector<64x16xf32>
    %c0_3 = arith.constant 0 : index
    %c0_4 = arith.constant 0 : index
    %c0_5 = arith.constant 0 : index
    %8 = vector.load %arg3[%c0_3, %c0_4, %c0_5] : memref<1x1x16xf32, #tpu.memory_space<vmem>>, vector<1x1x16xf32>
    %9 = vector.shape_cast %8 : vector<1x1x16xf32> to vector<1x16xf32>
    %10 = vector.broadcast %9 : vector<1x16xf32> to vector<64x16xf32>
    %11 = arith.addf %7, %10 : vector<64x16xf32>
    %c0_6 = arith.constant 0 : index
    %c0_7 = arith.constant 0 : index
    %c0_8 = arith.constant 0 : index
    %12 = vector.load %arg4[%c0_6, %c0_7, %c0_8] : memref<1x1x16xf32, #tpu.memory_space<vmem>>, vector<1x1x16xf32>
    %13 = vector.shape_cast %12 : vector<1x1x16xf32> to vector<1x16xf32>
    %14 = vector.broadcast %13 : vector<1x16xf32> to vector<64x16xf32>
    %15 = arith.mulf %11, %14 : vector<64x16xf32>
    %c0_9 = arith.constant 0 : index
    %c0_10 = arith.constant 0 : index
    %c0_11 = arith.constant 0 : index
    %16 = vector.load %arg5[%c0_9, %c0_10, %c0_11] : memref<1x16x16xf32, #tpu.memory_space<vmem>>, vector<1x16x16xf32>
    %17 = vector.shape_cast %16 : vector<1x16x16xf32> to vector<16x16xf32>
    %cst = arith.constant dense<0.000000e+00> : vector<64x16xf32>
    %18 = tpu.matmul %15, %17, %cst {dimension_numbers = #tpu.dot_dimension_numbers<[1], [0], [0], [1], [0, 0, 1, 1], [], []>} : vector<64x16xf32>, vector<16x16xf32>, vector<64x16xf32> -> vector<64x16xf32>
    %19 = vector.extract_strided_slice %18 {offsets = [0, 0], sizes = [64, 8], strides = [1, 1]} : vector<64x16xf32> to vector<64x8xf32>
    %20 = vector.extract_strided_slice %18 {offsets = [0, 8], sizes = [64, 8], strides = [1, 1]} : vector<64x16xf32> to vector<64x8xf32>
    %c0_12 = arith.constant 0 : index
    %c0_13 = arith.constant 0 : index
    %c0_14 = arith.constant 0 : index
    %21 = vector.load %arg6[%c0_12, %c0_13, %c0_14] : memref<1x72x32xf32, #tpu.memory_space<vmem>>, vector<1x72x32xf32>
    %22 = vector.shape_cast %21 : vector<1x72x32xf32> to vector<72x32xf32>
    %c0_15 = arith.constant 0 : index
    %c0_16 = arith.constant 0 : index
    %c0_17 = arith.constant 0 : index
    %23 = vector.load %arg7[%c0_15, %c0_16, %c0_17] : memref<1x1x32xf32, #tpu.memory_space<vmem>>, vector<1x1x32xf32>
    %24 = vector.shape_cast %23 : vector<1x1x32xf32> to vector<1x32xf32>
    %cst_18 = arith.constant 0.000000e+00 : f32
    %25 = vector.broadcast %cst_18 : f32 to vector<9x8xf32>
    %26 = vector.extract_strided_slice %19 {offsets = [0, 0], sizes = [55, 8], strides = [1, 1]} : vector<64x8xf32> to vector<55x8xf32>
    %27 = tpu.concatenate %25, %26 in 0 : vector<9x8xf32>, vector<55x8xf32> -> vector<64x8xf32>
    %c8_i32 = arith.constant 8 : i32
    %28 = vector.broadcast %c8_i32 : i32 to vector<64x1xi32>
    %29 = arith.cmpi sge, %3, %28 : vector<64x1xi32>
    %c1_i32 = arith.constant 1 : i32
    %30 = vector.broadcast %c1_i32 : i32 to vector<64x1xi32>
    %31 = arith.cmpi sge, %5, %30 : vector<64x1xi32>
    %32 = arith.andi %29, %31 : vector<64x1xi1>
    %cst_19 = arith.constant 0.000000e+00 : f32
    %33 = vector.shape_cast %32 : vector<64x1xi1> to vector<64x1xi1>
    %34 = vector.broadcast %33 : vector<64x1xi1> to vector<64x8xi1>
    %35 = vector.broadcast %cst_19 : f32 to vector<64x8xf32>
    %36 = arith.select %34, %27, %35 : vector<64x8xi1>, vector<64x8xf32>
    %cst_20 = arith.constant 0.000000e+00 : f32
    %37 = vector.broadcast %cst_20 : f32 to vector<8x8xf32>
    %38 = vector.extract_strided_slice %19 {offsets = [0, 0], sizes = [56, 8], strides = [1, 1]} : vector<64x8xf32> to vector<56x8xf32>
    %39 = tpu.concatenate %37, %38 in 0 : vector<8x8xf32>, vector<56x8xf32> -> vector<64x8xf32>
    %c8_i32_21 = arith.constant 8 : i32
    %40 = vector.broadcast %c8_i32_21 : i32 to vector<64x1xi32>
    %41 = arith.cmpi sge, %3, %40 : vector<64x1xi32>
    %cst_22 = arith.constant 0.000000e+00 : f32
    %42 = vector.shape_cast %41 : vector<64x1xi1> to vector<64x1xi1>
    %43 = vector.broadcast %42 : vector<64x1xi1> to vector<64x8xi1>
    %44 = vector.broadcast %cst_22 : f32 to vector<64x8xf32>
    %45 = arith.select %43, %39, %44 : vector<64x8xi1>, vector<64x8xf32>
    %cst_23 = arith.constant 0.000000e+00 : f32
    %46 = vector.broadcast %cst_23 : f32 to vector<7x8xf32>
    %47 = vector.extract_strided_slice %19 {offsets = [0, 0], sizes = [57, 8], strides = [1, 1]} : vector<64x8xf32> to vector<57x8xf32>
    %48 = tpu.concatenate %46, %47 in 0 : vector<7x8xf32>, vector<57x8xf32> -> vector<64x8xf32>
    %c8_i32_24 = arith.constant 8 : i32
    %49 = vector.broadcast %c8_i32_24 : i32 to vector<64x1xi32>
    %50 = arith.cmpi sge, %3, %49 : vector<64x1xi32>
    %c7_i32_25 = arith.constant 7 : i32
    %51 = vector.broadcast %c7_i32_25 : i32 to vector<64x1xi32>
    %52 = arith.cmpi slt, %5, %51 : vector<64x1xi32>
    %53 = arith.andi %50, %52 : vector<64x1xi1>
    %cst_26 = arith.constant 0.000000e+00 : f32
    %54 = vector.shape_cast %53 : vector<64x1xi1> to vector<64x1xi1>
    %55 = vector.broadcast %54 : vector<64x1xi1> to vector<64x8xi1>
    %56 = vector.broadcast %cst_26 : f32 to vector<64x8xf32>
    %57 = arith.select %55, %48, %56 : vector<64x8xi1>, vector<64x8xf32>
    %cst_27 = arith.constant 0.000000e+00 : f32
    %58 = vector.broadcast %cst_27 : f32 to vector<1x8xf32>
    %59 = vector.extract_strided_slice %19 {offsets = [0, 0], sizes = [63, 8], strides = [1, 1]} : vector<64x8xf32> to vector<63x8xf32>
    %60 = tpu.concatenate %58, %59 in 0 : vector<1x8xf32>, vector<63x8xf32> -> vector<64x8xf32>
    %c1_i32_28 = arith.constant 1 : i32
    %61 = vector.broadcast %c1_i32_28 : i32 to vector<64x1xi32>
    %62 = arith.cmpi sge, %5, %61 : vector<64x1xi32>
    %cst_29 = arith.constant 0.000000e+00 : f32
    %63 = vector.shape_cast %62 : vector<64x1xi1> to vector<64x1xi1>
    %64 = vector.broadcast %63 : vector<64x1xi1> to vector<64x8xi1>
    %65 = vector.broadcast %cst_29 : f32 to vector<64x8xf32>
    %66 = arith.select %64, %60, %65 : vector<64x8xi1>, vector<64x8xf32>
    %cst_30 = arith.constant 0.000000e+00 : f32
    %67 = vector.broadcast %cst_30 : f32 to vector<1x8xf32>
    %68 = vector.extract_strided_slice %19 {offsets = [1, 0], sizes = [63, 8], strides = [1, 1]} : vector<64x8xf32> to vector<63x8xf32>
    %69 = tpu.concatenate %68, %67 in 0 : vector<63x8xf32>, vector<1x8xf32> -> vector<64x8xf32>
    %c7_i32_31 = arith.constant 7 : i32
    %70 = vector.broadcast %c7_i32_31 : i32 to vector<64x1xi32>
    %71 = arith.cmpi slt, %5, %70 : vector<64x1xi32>
    %cst_32 = arith.constant 0.000000e+00 : f32
    %72 = vector.shape_cast %71 : vector<64x1xi1> to vector<64x1xi1>
    %73 = vector.broadcast %72 : vector<64x1xi1> to vector<64x8xi1>
    %74 = vector.broadcast %cst_32 : f32 to vector<64x8xf32>
    %75 = arith.select %73, %69, %74 : vector<64x8xi1>, vector<64x8xf32>
    %cst_33 = arith.constant 0.000000e+00 : f32
    %76 = vector.broadcast %cst_33 : f32 to vector<7x8xf32>
    %77 = vector.extract_strided_slice %19 {offsets = [7, 0], sizes = [57, 8], strides = [1, 1]} : vector<64x8xf32> to vector<57x8xf32>
    %78 = tpu.concatenate %77, %76 in 0 : vector<57x8xf32>, vector<7x8xf32> -> vector<64x8xf32>
    %c56_i32 = arith.constant 56 : i32
    %79 = vector.broadcast %c56_i32 : i32 to vector<64x1xi32>
    %80 = arith.cmpi slt, %3, %79 : vector<64x1xi32>
    %c1_i32_34 = arith.constant 1 : i32
    %81 = vector.broadcast %c1_i32_34 : i32 to vector<64x1xi32>
    %82 = arith.cmpi sge, %5, %81 : vector<64x1xi32>
    %83 = arith.andi %80, %82 : vector<64x1xi1>
    %cst_35 = arith.constant 0.000000e+00 : f32
    %84 = vector.shape_cast %83 : vector<64x1xi1> to vector<64x1xi1>
    %85 = vector.broadcast %84 : vector<64x1xi1> to vector<64x8xi1>
    %86 = vector.broadcast %cst_35 : f32 to vector<64x8xf32>
    %87 = arith.select %85, %78, %86 : vector<64x8xi1>, vector<64x8xf32>
    %cst_36 = arith.constant 0.000000e+00 : f32
    %88 = vector.broadcast %cst_36 : f32 to vector<8x8xf32>
    %89 = vector.extract_strided_slice %19 {offsets = [8, 0], sizes = [56, 8], strides = [1, 1]} : vector<64x8xf32> to vector<56x8xf32>
    %90 = tpu.concatenate %89, %88 in 0 : vector<56x8xf32>, vector<8x8xf32> -> vector<64x8xf32>
    %c56_i32_37 = arith.constant 56 : i32
    %91 = vector.broadcast %c56_i32_37 : i32 to vector<64x1xi32>
    %92 = arith.cmpi slt, %3, %91 : vector<64x1xi32>
    %cst_38 = arith.constant 0.000000e+00 : f32
    %93 = vector.shape_cast %92 : vector<64x1xi1> to vector<64x1xi1>
    %94 = vector.broadcast %93 : vector<64x1xi1> to vector<64x8xi1>
    %95 = vector.broadcast %cst_38 : f32 to vector<64x8xf32>
    %96 = arith.select %94, %90, %95 : vector<64x8xi1>, vector<64x8xf32>
    %cst_39 = arith.constant 0.000000e+00 : f32
    %97 = vector.broadcast %cst_39 : f32 to vector<9x8xf32>
    %98 = vector.extract_strided_slice %19 {offsets = [9, 0], sizes = [55, 8], strides = [1, 1]} : vector<64x8xf32> to vector<55x8xf32>
    %99 = tpu.concatenate %98, %97 in 0 : vector<55x8xf32>, vector<9x8xf32> -> vector<64x8xf32>
    %c56_i32_40 = arith.constant 56 : i32
    %100 = vector.broadcast %c56_i32_40 : i32 to vector<64x1xi32>
    %101 = arith.cmpi slt, %3, %100 : vector<64x1xi32>
    %c7_i32_41 = arith.constant 7 : i32
    %102 = vector.broadcast %c7_i32_41 : i32 to vector<64x1xi32>
    %103 = arith.cmpi slt, %5, %102 : vector<64x1xi32>
    %104 = arith.andi %101, %103 : vector<64x1xi1>
    %cst_42 = arith.constant 0.000000e+00 : f32
    %105 = vector.shape_cast %104 : vector<64x1xi1> to vector<64x1xi1>
    %106 = vector.broadcast %105 : vector<64x1xi1> to vector<64x8xi1>
    %107 = vector.broadcast %cst_42 : f32 to vector<64x8xf32>
    %108 = arith.select %106, %99, %107 : vector<64x8xi1>, vector<64x8xf32>
    %109 = tpu.concatenate %36, %45, %57, %66, %19, %75, %87, %96, %108 in 1 : vector<64x8xf32>, vector<64x8xf32>, vector<64x8xf32>, vector<64x8xf32>, vector<64x8xf32>, vector<64x8xf32>, vector<64x8xf32>, vector<64x8xf32>, vector<64x8xf32> -> vector<64x72xf32>
    %cst_43 = arith.constant dense<0.000000e+00> : vector<64x32xf32>
    %110 = tpu.matmul %109, %22, %cst_43 {dimension_numbers = #tpu.dot_dimension_numbers<[1], [0], [0], [1], [0, 0, 1, 1], [], []>} : vector<64x72xf32>, vector<72x32xf32>, vector<64x32xf32> -> vector<64x32xf32>
    %111 = vector.broadcast %24 : vector<1x32xf32> to vector<64x32xf32>
    %112 = arith.addf %110, %111 : vector<64x32xf32>
    %cst_44 = arith.constant 0.000000e+00 : f32
    %113 = vector.broadcast %cst_44 : f32 to vector<64x32xf32>
    %114 = arith.maximumf %112, %113 : vector<64x32xf32>
    %c0_45 = arith.constant 0 : index
    %c0_46 = arith.constant 0 : index
    %c0_47 = arith.constant 0 : index
    %115 = vector.load %arg8[%c0_45, %c0_46, %c0_47] : memref<1x32x32xf32, #tpu.memory_space<vmem>>, vector<1x32x32xf32>
    %116 = vector.shape_cast %115 : vector<1x32x32xf32> to vector<32x32xf32>
    %cst_48 = arith.constant dense<0.000000e+00> : vector<64x32xf32>
    %117 = tpu.matmul %114, %116, %cst_48 {dimension_numbers = #tpu.dot_dimension_numbers<[1], [0], [0], [1], [0, 0, 1, 1], [], []>} : vector<64x32xf32>, vector<32x32xf32>, vector<64x32xf32> -> vector<64x32xf32>
    %c0_49 = arith.constant 0 : index
    %c0_50 = arith.constant 0 : index
    %c0_51 = arith.constant 0 : index
    %118 = vector.load %arg9[%c0_49, %c0_50, %c0_51] : memref<1x1x32xf32, #tpu.memory_space<vmem>>, vector<1x1x32xf32>
    %119 = vector.shape_cast %118 : vector<1x1x32xf32> to vector<1x32xf32>
    %120 = vector.broadcast %119 : vector<1x32xf32> to vector<64x32xf32>
    %121 = arith.addf %117, %120 : vector<64x32xf32>
    %cst_52 = arith.constant 0.000000e+00 : f32
    %122 = vector.broadcast %cst_52 : f32 to vector<64x32xf32>
    %123 = arith.maximumf %121, %122 : vector<64x32xf32>
    %c0_53 = arith.constant 0 : index
    %c0_54 = arith.constant 0 : index
    %c0_55 = arith.constant 0 : index
    %124 = vector.load %arg10[%c0_53, %c0_54, %c0_55] : memref<1x288x16xf32, #tpu.memory_space<vmem>>, vector<1x288x16xf32>
    %125 = vector.shape_cast %124 : vector<1x288x16xf32> to vector<288x16xf32>
    %c0_56 = arith.constant 0 : index
    %c0_57 = arith.constant 0 : index
    %c0_58 = arith.constant 0 : index
    %126 = vector.load %arg11[%c0_56, %c0_57, %c0_58] : memref<1x1x16xf32, #tpu.memory_space<vmem>>, vector<1x1x16xf32>
    %127 = vector.shape_cast %126 : vector<1x1x16xf32> to vector<1x16xf32>
    %cst_59 = arith.constant 0.000000e+00 : f32
    %128 = vector.broadcast %cst_59 : f32 to vector<9x32xf32>
    %129 = vector.extract_strided_slice %123 {offsets = [0, 0], sizes = [55, 32], strides = [1, 1]} : vector<64x32xf32> to vector<55x32xf32>
    %130 = tpu.concatenate %128, %129 in 0 : vector<9x32xf32>, vector<55x32xf32> -> vector<64x32xf32>
    %c8_i32_60 = arith.constant 8 : i32
    %131 = vector.broadcast %c8_i32_60 : i32 to vector<64x1xi32>
    %132 = arith.cmpi sge, %3, %131 : vector<64x1xi32>
    %c1_i32_61 = arith.constant 1 : i32
    %133 = vector.broadcast %c1_i32_61 : i32 to vector<64x1xi32>
    %134 = arith.cmpi sge, %5, %133 : vector<64x1xi32>
    %135 = arith.andi %132, %134 : vector<64x1xi1>
    %cst_62 = arith.constant 0.000000e+00 : f32
    %136 = vector.shape_cast %135 : vector<64x1xi1> to vector<64x1xi1>
    %137 = vector.broadcast %136 : vector<64x1xi1> to vector<64x32xi1>
    %138 = vector.broadcast %cst_62 : f32 to vector<64x32xf32>
    %139 = arith.select %137, %130, %138 : vector<64x32xi1>, vector<64x32xf32>
    %cst_63 = arith.constant 0.000000e+00 : f32
    %140 = vector.broadcast %cst_63 : f32 to vector<8x32xf32>
    %141 = vector.extract_strided_slice %123 {offsets = [0, 0], sizes = [56, 32], strides = [1, 1]} : vector<64x32xf32> to vector<56x32xf32>
    %142 = tpu.concatenate %140, %141 in 0 : vector<8x32xf32>, vector<56x32xf32> -> vector<64x32xf32>
    %c8_i32_64 = arith.constant 8 : i32
    %143 = vector.broadcast %c8_i32_64 : i32 to vector<64x1xi32>
    %144 = arith.cmpi sge, %3, %143 : vector<64x1xi32>
    %cst_65 = arith.constant 0.000000e+00 : f32
    %145 = vector.shape_cast %144 : vector<64x1xi1> to vector<64x1xi1>
    %146 = vector.broadcast %145 : vector<64x1xi1> to vector<64x32xi1>
    %147 = vector.broadcast %cst_65 : f32 to vector<64x32xf32>
    %148 = arith.select %146, %142, %147 : vector<64x32xi1>, vector<64x32xf32>
    %cst_66 = arith.constant 0.000000e+00 : f32
    %149 = vector.broadcast %cst_66 : f32 to vector<7x32xf32>
    %150 = vector.extract_strided_slice %123 {offsets = [0, 0], sizes = [57, 32], strides = [1, 1]} : vector<64x32xf32> to vector<57x32xf32>
    %151 = tpu.concatenate %149, %150 in 0 : vector<7x32xf32>, vector<57x32xf32> -> vector<64x32xf32>
    %c8_i32_67 = arith.constant 8 : i32
    %152 = vector.broadcast %c8_i32_67 : i32 to vector<64x1xi32>
    %153 = arith.cmpi sge, %3, %152 : vector<64x1xi32>
    %c7_i32_68 = arith.constant 7 : i32
    %154 = vector.broadcast %c7_i32_68 : i32 to vector<64x1xi32>
    %155 = arith.cmpi slt, %5, %154 : vector<64x1xi32>
    %156 = arith.andi %153, %155 : vector<64x1xi1>
    %cst_69 = arith.constant 0.000000e+00 : f32
    %157 = vector.shape_cast %156 : vector<64x1xi1> to vector<64x1xi1>
    %158 = vector.broadcast %157 : vector<64x1xi1> to vector<64x32xi1>
    %159 = vector.broadcast %cst_69 : f32 to vector<64x32xf32>
    %160 = arith.select %158, %151, %159 : vector<64x32xi1>, vector<64x32xf32>
    %cst_70 = arith.constant 0.000000e+00 : f32
    %161 = vector.broadcast %cst_70 : f32 to vector<1x32xf32>
    %162 = vector.extract_strided_slice %123 {offsets = [0, 0], sizes = [63, 32], strides = [1, 1]} : vector<64x32xf32> to vector<63x32xf32>
    %163 = tpu.concatenate %161, %162 in 0 : vector<1x32xf32>, vector<63x32xf32> -> vector<64x32xf32>
    %c1_i32_71 = arith.constant 1 : i32
    %164 = vector.broadcast %c1_i32_71 : i32 to vector<64x1xi32>
    %165 = arith.cmpi sge, %5, %164 : vector<64x1xi32>
    %cst_72 = arith.constant 0.000000e+00 : f32
    %166 = vector.shape_cast %165 : vector<64x1xi1> to vector<64x1xi1>
    %167 = vector.broadcast %166 : vector<64x1xi1> to vector<64x32xi1>
    %168 = vector.broadcast %cst_72 : f32 to vector<64x32xf32>
    %169 = arith.select %167, %163, %168 : vector<64x32xi1>, vector<64x32xf32>
    %cst_73 = arith.constant 0.000000e+00 : f32
    %170 = vector.broadcast %cst_73 : f32 to vector<1x32xf32>
    %171 = vector.extract_strided_slice %123 {offsets = [1, 0], sizes = [63, 32], strides = [1, 1]} : vector<64x32xf32> to vector<63x32xf32>
    %172 = tpu.concatenate %171, %170 in 0 : vector<63x32xf32>, vector<1x32xf32> -> vector<64x32xf32>
    %c7_i32_74 = arith.constant 7 : i32
    %173 = vector.broadcast %c7_i32_74 : i32 to vector<64x1xi32>
    %174 = arith.cmpi slt, %5, %173 : vector<64x1xi32>
    %cst_75 = arith.constant 0.000000e+00 : f32
    %175 = vector.shape_cast %174 : vector<64x1xi1> to vector<64x1xi1>
    %176 = vector.broadcast %175 : vector<64x1xi1> to vector<64x32xi1>
    %177 = vector.broadcast %cst_75 : f32 to vector<64x32xf32>
    %178 = arith.select %176, %172, %177 : vector<64x32xi1>, vector<64x32xf32>
    %cst_76 = arith.constant 0.000000e+00 : f32
    %179 = vector.broadcast %cst_76 : f32 to vector<7x32xf32>
    %180 = vector.extract_strided_slice %123 {offsets = [7, 0], sizes = [57, 32], strides = [1, 1]} : vector<64x32xf32> to vector<57x32xf32>
    %181 = tpu.concatenate %180, %179 in 0 : vector<57x32xf32>, vector<7x32xf32> -> vector<64x32xf32>
    %c56_i32_77 = arith.constant 56 : i32
    %182 = vector.broadcast %c56_i32_77 : i32 to vector<64x1xi32>
    %183 = arith.cmpi slt, %3, %182 : vector<64x1xi32>
    %c1_i32_78 = arith.constant 1 : i32
    %184 = vector.broadcast %c1_i32_78 : i32 to vector<64x1xi32>
    %185 = arith.cmpi sge, %5, %184 : vector<64x1xi32>
    %186 = arith.andi %183, %185 : vector<64x1xi1>
    %cst_79 = arith.constant 0.000000e+00 : f32
    %187 = vector.shape_cast %186 : vector<64x1xi1> to vector<64x1xi1>
    %188 = vector.broadcast %187 : vector<64x1xi1> to vector<64x32xi1>
    %189 = vector.broadcast %cst_79 : f32 to vector<64x32xf32>
    %190 = arith.select %188, %181, %189 : vector<64x32xi1>, vector<64x32xf32>
    %cst_80 = arith.constant 0.000000e+00 : f32
    %191 = vector.broadcast %cst_80 : f32 to vector<8x32xf32>
    %192 = vector.extract_strided_slice %123 {offsets = [8, 0], sizes = [56, 32], strides = [1, 1]} : vector<64x32xf32> to vector<56x32xf32>
    %193 = tpu.concatenate %192, %191 in 0 : vector<56x32xf32>, vector<8x32xf32> -> vector<64x32xf32>
    %c56_i32_81 = arith.constant 56 : i32
    %194 = vector.broadcast %c56_i32_81 : i32 to vector<64x1xi32>
    %195 = arith.cmpi slt, %3, %194 : vector<64x1xi32>
    %cst_82 = arith.constant 0.000000e+00 : f32
    %196 = vector.shape_cast %195 : vector<64x1xi1> to vector<64x1xi1>
    %197 = vector.broadcast %196 : vector<64x1xi1> to vector<64x32xi1>
    %198 = vector.broadcast %cst_82 : f32 to vector<64x32xf32>
    %199 = arith.select %197, %193, %198 : vector<64x32xi1>, vector<64x32xf32>
    %cst_83 = arith.constant 0.000000e+00 : f32
    %200 = vector.broadcast %cst_83 : f32 to vector<9x32xf32>
    %201 = vector.extract_strided_slice %123 {offsets = [9, 0], sizes = [55, 32], strides = [1, 1]} : vector<64x32xf32> to vector<55x32xf32>
    %202 = tpu.concatenate %201, %200 in 0 : vector<55x32xf32>, vector<9x32xf32> -> vector<64x32xf32>
    %c56_i32_84 = arith.constant 56 : i32
    %203 = vector.broadcast %c56_i32_84 : i32 to vector<64x1xi32>
    %204 = arith.cmpi slt, %3, %203 : vector<64x1xi32>
    %c7_i32_85 = arith.constant 7 : i32
    %205 = vector.broadcast %c7_i32_85 : i32 to vector<64x1xi32>
    %206 = arith.cmpi slt, %5, %205 : vector<64x1xi32>
    %207 = arith.andi %204, %206 : vector<64x1xi1>
    %cst_86 = arith.constant 0.000000e+00 : f32
    %208 = vector.shape_cast %207 : vector<64x1xi1> to vector<64x1xi1>
    %209 = vector.broadcast %208 : vector<64x1xi1> to vector<64x32xi1>
    %210 = vector.broadcast %cst_86 : f32 to vector<64x32xf32>
    %211 = arith.select %209, %202, %210 : vector<64x32xi1>, vector<64x32xf32>
    %212 = tpu.concatenate %139, %148, %160, %169, %123, %178, %190, %199, %211 in 1 : vector<64x32xf32>, vector<64x32xf32>, vector<64x32xf32>, vector<64x32xf32>, vector<64x32xf32>, vector<64x32xf32>, vector<64x32xf32>, vector<64x32xf32>, vector<64x32xf32> -> vector<64x288xf32>
    %cst_87 = arith.constant dense<0.000000e+00> : vector<64x16xf32>
    %213 = tpu.matmul %212, %125, %cst_87 {dimension_numbers = #tpu.dot_dimension_numbers<[1], [0], [0], [1], [0, 0, 1, 1], [], []>} : vector<64x288xf32>, vector<288x16xf32>, vector<64x16xf32> -> vector<64x16xf32>
    %214 = vector.broadcast %127 : vector<1x16xf32> to vector<64x16xf32>
    %215 = arith.addf %213, %214 : vector<64x16xf32>
    %216 = vector.extract_strided_slice %215 {offsets = [0, 0], sizes = [64, 8], strides = [1, 1]} : vector<64x16xf32> to vector<64x8xf32>
    %217 = vector.extract_strided_slice %215 {offsets = [0, 8], sizes = [64, 8], strides = [1, 1]} : vector<64x16xf32> to vector<64x8xf32>
    %cst_88 = arith.constant 2.000000e+00 : f32
    %218 = vector.broadcast %cst_88 : f32 to vector<64x8xf32>
    %219 = arith.addf %217, %218 : vector<64x8xf32>
    %220 = arith.negf %219 : vector<64x8xf32>
    %221 = math.exp %220 : vector<64x8xf32>
    %cst_89 = arith.constant 1.000000e+00 : f32
    %222 = vector.broadcast %cst_89 : f32 to vector<64x8xf32>
    %223 = arith.addf %222, %221 : vector<64x8xf32>
    %224 = arith.divf %222, %223 : vector<64x8xf32>
    %cst_90 = arith.constant 0.000000e+00 : f32
    %225 = vector.broadcast %cst_90 : f32 to vector<64x8xf32>
    %226 = arith.subf %225, %219 : vector<64x8xf32>
    %cst_91 = arith.constant 0.000000e+00 : f32
    %227 = vector.broadcast %cst_91 : f32 to vector<64x8xf32>
    %228 = arith.maximumf %226, %227 : vector<64x8xf32>
    %229 = math.absf %219 : vector<64x8xf32>
    %cst_92 = arith.constant 0.000000e+00 : f32
    %230 = vector.broadcast %cst_92 : f32 to vector<64x8xf32>
    %231 = arith.subf %230, %229 : vector<64x8xf32>
    %232 = math.exp %231 : vector<64x8xf32>
    %cst_93 = arith.constant 1.000000e+00 : f32
    %233 = vector.broadcast %cst_93 : f32 to vector<64x8xf32>
    %234 = arith.addf %233, %232 : vector<64x8xf32>
    %235 = math.log %234 : vector<64x8xf32>
    %236 = arith.addf %228, %235 : vector<64x8xf32>
    %cst_94 = arith.constant 0.000000e+00 : f32
    %237 = vector.broadcast %cst_94 : f32 to vector<64x8xf32>
    %238 = arith.subf %237, %236 : vector<64x8xf32>
    %239 = arith.addf %20, %216 : vector<64x8xf32>
    %240 = arith.mulf %239, %224 : vector<64x8xf32>
    %241 = tpu.concatenate %19, %240 in 1 : vector<64x8xf32>, vector<64x8xf32> -> vector<64x16xf32>
    %c0_95 = arith.constant 0 : index
    %c0_96 = arith.constant 0 : index
    %c0_97 = arith.constant 0 : index
    %242 = vector.load %arg12[%c0_95, %c0_96, %c0_97] : memref<1x64x16xf32, #tpu.memory_space<vmem>>, vector<1x64x16xf32>
    %243 = vector.shape_cast %242 : vector<1x64x16xf32> to vector<64x16xf32>
    %244 = vector.shape_cast %241 : vector<64x16xf32> to vector<1x64x16xf32>
    tpu.vector_store %arg12[%c0_95, %c0_96, %c0_97], %244 {strides = array<i32>} : memref<1x64x16xf32, #tpu.memory_space<vmem>>, vector<1x64x16xf32>,
    %cst_98 = arith.constant dense<0.000000e+00> : vector<64xf32>
    %245 = vector.multi_reduction <add>, %238, %cst_98 [1] : vector<64x8xf32> to vector<64xf32>
    %246 = vector.shape_cast %245 : vector<64xf32> to vector<64x1xf32>
    %cst_99 = arith.constant dense<0.000000e+00> : vector<1xf32>
    %247 = vector.multi_reduction <add>, %246, %cst_99 [0] : vector<64x1xf32> to vector<1xf32>
    %248 = vector.shape_cast %247 : vector<1xf32> to vector<1x1xf32>
    %c0_100 = arith.constant 0 : index
    %c0_101 = arith.constant 0 : index
    %249 = vector.load %arg14[%c0_100, %c0_101] : memref<1x1xf32, #tpu.memory_space<vmem>>, vector<1x1xf32>
    %250 = arith.addf %249, %248 : vector<1x1xf32>
    %c0_102 = arith.constant 0 : index
    %c0_103 = arith.constant 0 : index
    %251 = vector.load %arg14[%c0_102, %c0_103] : memref<1x1xf32, #tpu.memory_space<vmem>>, vector<1x1xf32>
    tpu.vector_store %arg14[%c0_102, %c0_103], %250 {strides = array<i32>} : memref<1x1xf32, #tpu.memory_space<vmem>>, vector<1x1xf32>,
    %c1_i32_104 = arith.constant 1 : i32
    %252 = arith.cmpi eq, %arg1, %c1_i32_104 : i32
    %253 = arith.extui %252 : i1 to i32
    %c0_i32_105 = arith.constant 0 : i32
    %254 = arith.cmpi ne, %253, %c0_i32_105 : i32
    scf.if %254 {
      %255 = arith.mulf %241, %241 : vector<64x16xf32>
      %cst_106 = arith.constant dense<0.000000e+00> : vector<64xf32>
      %256 = vector.multi_reduction <add>, %255, %cst_106 [1] : vector<64x16xf32> to vector<64xf32>
      %257 = vector.shape_cast %256 : vector<64xf32> to vector<64x1xf32>
      %cst_107 = arith.constant dense<0.000000e+00> : vector<1xf32>
      %258 = vector.multi_reduction <add>, %257, %cst_107 [0] : vector<64x1xf32> to vector<1xf32>
      %259 = vector.shape_cast %258 : vector<1xf32> to vector<1x1xf32>
      %cst_108 = arith.constant -5.000000e-01 : f32
      %260 = vector.broadcast %cst_108 : f32 to vector<1x1xf32>
      %261 = arith.mulf %260, %259 : vector<1x1xf32>
      %cst_109 = arith.constant 940.993041 : f32
      %262 = vector.broadcast %cst_109 : f32 to vector<1x1xf32>
      %263 = arith.subf %261, %262 : vector<1x1xf32>
      %c0_110 = arith.constant 0 : index
      %c0_111 = arith.constant 0 : index
      %264 = vector.load %arg14[%c0_110, %c0_111] : memref<1x1xf32, #tpu.memory_space<vmem>>, vector<1x1xf32>
      %265 = vector.shape_cast %264 : vector<1x1xf32> to vector<1x1xf32>
      %266 = vector.broadcast %265 : vector<1x1xf32> to vector<1x128xf32>
      %267 = vector.shape_cast %263 : vector<1x1xf32> to vector<1x1xf32>
      %268 = vector.broadcast %267 : vector<1x1xf32> to vector<1x128xf32>
      %269 = tpu.concatenate %266, %268 in 0 : vector<1x128xf32>, vector<1x128xf32> -> vector<2x128xf32>
      %c0_112 = arith.constant 0 : index
      %c0_113 = arith.constant 0 : index
      %c0_114 = arith.constant 0 : index
      %270 = vector.load %arg13[%c0_112, %c0_113, %c0_114] : memref<1x2x128xf32, #tpu.memory_space<vmem>>, vector<1x2x128xf32>
      %271 = vector.shape_cast %270 : vector<1x2x128xf32> to vector<2x128xf32>
      %272 = vector.shape_cast %269 : vector<2x128xf32> to vector<1x2x128xf32>
      tpu.vector_store %arg13[%c0_112, %c0_113, %c0_114], %272 {strides = array<i32>} : memref<1x2x128xf32, #tpu.memory_space<vmem>>, vector<1x2x128xf32>,
    } else {
    }
    return
  }
  func.func @transform_0(%arg0: i32, %arg1: i32) -> (i32, i32, i32) {
    %c0_i32 = arith.constant 0 : i32
    %c0_i32_0 = arith.constant 0 : i32
    %c0_i32_1 = arith.constant 0 : i32
    return %arg0, %c0_i32, %c0_i32_0 : i32, i32, i32
  }
  func.func @transform_1(%arg0: i32, %arg1: i32) -> (i32, i32, i32) {
    %c0_i32 = arith.constant 0 : i32
    %c0_i32_0 = arith.constant 0 : i32
    %c0_i32_1 = arith.constant 0 : i32
    return %arg1, %c0_i32, %c0_i32_0 : i32, i32, i32
  }
  func.func @transform_2(%arg0: i32, %arg1: i32) -> (i32, i32, i32) {
    %c0_i32 = arith.constant 0 : i32
    %c0_i32_0 = arith.constant 0 : i32
    %c0_i32_1 = arith.constant 0 : i32
    return %arg1, %c0_i32, %c0_i32_0 : i32, i32, i32
  }
  func.func @transform_3(%arg0: i32, %arg1: i32) -> (i32, i32, i32) {
    %c0_i32 = arith.constant 0 : i32
    %c0_i32_0 = arith.constant 0 : i32
    %c0_i32_1 = arith.constant 0 : i32
    return %arg1, %c0_i32, %c0_i32_0 : i32, i32, i32
  }
  func.func @transform_4(%arg0: i32, %arg1: i32) -> (i32, i32, i32) {
    %c0_i32 = arith.constant 0 : i32
    %c0_i32_0 = arith.constant 0 : i32
    %c0_i32_1 = arith.constant 0 : i32
    return %arg1, %c0_i32, %c0_i32_0 : i32, i32, i32
  }
  func.func @transform_5(%arg0: i32, %arg1: i32) -> (i32, i32, i32) {
    %c0_i32 = arith.constant 0 : i32
    %c0_i32_0 = arith.constant 0 : i32
    %c0_i32_1 = arith.constant 0 : i32
    return %arg1, %c0_i32, %c0_i32_0 : i32, i32, i32
  }
  func.func @transform_6(%arg0: i32, %arg1: i32) -> (i32, i32, i32) {
    %c0_i32 = arith.constant 0 : i32
    %c0_i32_0 = arith.constant 0 : i32
    %c0_i32_1 = arith.constant 0 : i32
    return %arg1, %c0_i32, %c0_i32_0 : i32, i32, i32
  }
  func.func @transform_7(%arg0: i32, %arg1: i32) -> (i32, i32, i32) {
    %c0_i32 = arith.constant 0 : i32
    %c0_i32_0 = arith.constant 0 : i32
    %c0_i32_1 = arith.constant 0 : i32
    return %arg1, %c0_i32, %c0_i32_0 : i32, i32, i32
  }
  func.func @transform_8(%arg0: i32, %arg1: i32) -> (i32, i32, i32) {
    %c0_i32 = arith.constant 0 : i32
    %c0_i32_0 = arith.constant 0 : i32
    %c0_i32_1 = arith.constant 0 : i32
    return %arg1, %c0_i32, %c0_i32_0 : i32, i32, i32
  }
  func.func @transform_9(%arg0: i32, %arg1: i32) -> (i32, i32, i32) {
    %c0_i32 = arith.constant 0 : i32
    %c0_i32_0 = arith.constant 0 : i32
    %c0_i32_1 = arith.constant 0 : i32
    return %arg1, %c0_i32, %c0_i32_0 : i32, i32, i32
  }
  func.func @transform_10(%arg0: i32, %arg1: i32) -> (i32, i32, i32) {
    %c0_i32 = arith.constant 0 : i32
    %c0_i32_0 = arith.constant 0 : i32
    %c0_i32_1 = arith.constant 0 : i32
    return %arg0, %c0_i32, %c0_i32_0 : i32, i32, i32
  }
  func.func @transform_11(%arg0: i32, %arg1: i32) -> (i32, i32, i32) {
    %c0_i32 = arith.constant 0 : i32
    %c0_i32_0 = arith.constant 0 : i32
    %c0_i32_1 = arith.constant 0 : i32
    return %arg0, %c0_i32, %c0_i32_0 : i32, i32, i32
  }
}

</mosaic_0001>

<bundles_post_ra>
// kernel: norm_flow_net_forward.1
= control target key start
LH: loop header
LB: loop body
LE: loop exit
PB: predicated region body
PF: predicated region fallthrough
CT: control target
= control target key end

     0   :  { %s4939_s0 = inlined_call_operand.vmem [shape: f32[2,64,16], index: 0, kind: input, shape index: {}]   ;;  %s4940_s1 = inlined_call_operand.vmem [shape: f32[2,1,16], index: 1, kind: input, shape index: {}]   ;;  %s4941_s2 = inlined_call_operand.vmem [shape: f32[2,1,16], index: 2, kind: input, shape index: {}]   ;;  %s4942_s3 = inlined_call_operand.vmem [shape: f32[2,16,16], index: 3, kind: input, shape index: {}]   ;;  %s4943_s4 = inlined_call_operand.vmem [shape: f32[2,72,32], index: 4, kind: input, shape index: {}]   ;;  %s4944_s5 = inlined_call_operand.vmem [shape: f32[2,1,32], index: 5, kind: input, shape index: {}]   ;;  %s4945_s6 = inlined_call_operand.vmem [shape: f32[2,32,32], index: 6, kind: input, shape index: {}]   ;;  %s4946_s7 = inlined_call_operand.vmem [shape: f32[2,1,32], index: 7, kind: input, shape index: {}]   ;;  %s4947_s8 = inlined_call_operand.vmem [shape: f32[2,288,16], index: 8, kind: input, shape index: {}]   ;;  %s4948_s9 = inlined_call_operand.vmem [shape: f32[2,1,16], index: 9, kind: input, shape index: {}]   ;;  %s4949_s10 = inlined_call_operand.hbm [shape: f32[2,64,16], index: 10, kind: output, shape index: {0}]   ;;  %s4950_s11 = inlined_call_operand.vmem [shape: f32[2,2,128], index: 11, kind: output, shape index: {1}]  }
   0x1   :  { %4994 = sst [smem:[#allocation19_spill]] %s4939_s0 }
   0x2   :  { %4995 = sst [smem:[#allocation20_spill]] %s4942_s3 }
   0x3   :  { %4996 = sst [smem:[#allocation21_spill]] %s4949_s10 }
   0x4   :  { %17 = vsyncpa [#allocation4], 0 }
   0x5   :  { %19 = vsyncpa [#allocation4 + $0x1], 0  ;;  %s3656_s17 = smov 0   ;;  %s3658_s18 = smov 0  }
   0x6   :  { %s3660_s19 = smov 0   ;;  %s3662_s20 = smov 0  }
   0x7   :  { %s3664_s21 = smov 0   ;;  %s3666_s22 = smov 0  }
   0x8   :  { %s3668_s23 = smov 0   ;;  %s3670_s24 = smov 0  }
   0x9 LB: > { %4997 = sst [smem:[#allocation6_spill]] %s3551_s17  ;;  %s2881_s25 = sadd.s32 4294967295, %s3579_s24   ;;  %s3579_s24 = sphi %s3670_s24, %s25_s24   ;;  %s3575_s23 = sphi %s3668_s23, %s5175_s23   ;;  %s3571_s22 = sphi %s3666_s22, %s5174_s22   ;;  %s3567_s21 = sphi %s3664_s21, %s5173_s21   ;;  %s3563_s20 = sphi %s3662_s20, %s5172_s20   ;;  %s3559_s19 = sphi %s3660_s19, %s5171_s19   ;;  %s3555_s18 = sphi %s3658_s18, %s5170_s18   ;;  %s3551_s17 = sphi %s3656_s17, %s5169_s17  }
   0xa   : > { %4998 = sst [smem:[#allocation7_spill]] %s3555_s18  ;;  %s2882_s26 = sadd.s32 4294967294, %s3579_s24  }
   0xb   : > { %4999 = sst [smem:[#allocation8_spill]] %s3559_s19  ;;  %s34_s27 = sadd.s32 1, %s3571_s22 }
   0xc   : > { %5000 = sst [smem:[#allocation9_spill]] %s3563_s20  ;;  %p35_p0 = scmp.ge.s32.totalorder %s34_s27, 2 }
   0xd   : > { %5001 = sst [smem:[#allocation10_spill]] %s3567_s21  ;;  %s37_s28 = sadd.s32 1, %s3575_s23 }
   0xe   : > { %5002 = sst [smem:[#allocation11_spill]] %s3571_s22  ;;  %p314_p1 = scmp.ne.s32.totalorder %s3559_s19, %s3555_s18 }
   0xf   : > { %5003 = sst [smem:[#allocation12_spill]] %s3575_s23  ;;  %p315_p2 = scmp.eq.s32.totalorder %s2881_s25, 3 }
  0x10   : > { %5004 = sst [smem:[#allocation13_spill]] %s3579_s24  ;;  %s5177_s27 = smov (%p35_p0, %s34_s27), 0 }
  0x11   : > { %5005 = sst [smem:[#allocation14_spill]] %s5177_s27  ;;  %s5179_s28 = smov (!%p35_p0, %s37_s28), %s3575_s23 }
  0x12   : > { %p3705_p3 = por %p315_p2, %p314_p1  ;;  %p320_p4 = scmp.ne.s32.totalorder %s3555_s18, %s3551_s17 }
  0x13   : > { %p39_p5 = scmp.ge.s32.totalorder %s5179_s28, 2  ;;  %p321_p6 = scmp.eq.s32.totalorder %s2882_s26, 3 }
  0x14   : > { %s5006_s29 = scalar_select %p3705_p3, 1, 0 }
  0x15   : > { %p2885_p7 = scmp.ge.s32.totalorder %s3579_s24, 1  ;;  %p435_p8 = scmp.lt.s32.totalorder %s3579_s24, 5 }
  0x16   : > { %5007 = sst [smem:[#allocation15_spill]] %s5006_s29  ;;  %s5181_s28 = smov (%p39_p5, %s5179_s28), 0 }
  0x17   : > { %5008 = sst [smem:[#allocation16_spill]] %s5181_s28  ;;  %p3715_p9 = por %p321_p6, %p320_p4 }
  0x18   : > { %p436_p10 = pnand %p2885_p7, %p435_p8  ;;  %s301_s12 = ssub.s32 %s3575_s23, %s5181_s28 }
  0x19   : > { %s5009_s30 = scalar_select %p3715_p9, 1, 0 }
  0x1a   : > { %s304_s13 = sadd.s32 1, %s3559_s19  ;;  %p302_p11 = scmp.eq.s32.totalorder %s301_s12, 0 }
  0x1b   : > { %5010 = sst [smem:[#allocation17_spill]] %s5009_s30  ;;  %439 = sbr.rel (%p436_p10) target bundleno = 1810 (0x712), region = 60 }
  0x1c   : > { %s3723_s14 = scalar_select %p302_p11, %s3559_s19, %s304_s13  }
  0x1d   : > { %s4953_s15 = sand.u32 (!%p436_p10), 1, %s3555_s18   ;;  %p514_p12 = scmp.lt.s32.totalorder (!%p436_p10), %s3567_s21, 1 }
  0x1e   : > { %5011 = sst [smem:[#allocation18_spill]] %s3723_s14  ;;  %s2886_s16 = sshll.u32 (!%p436_p10), %s4953_s15, 6 }
  0x1f   : > { %p519_p13 = scmp.lt.s32.totalorder (!%p436_p10), %s3563_s20, 1  ;;  %s5012_s0 = sld [smem:[#allocation19_spill]] (!%p436_p10) }
  0x20   : > { %s5013_s3 = sld [smem:[#allocation20_spill]] (!%p436_p10)  ;;  %s5014_s19 = sld [smem:[#allocation9_spill]] (!%p436_p10) }
  0x22   : > { %s515_s25 = scalar_select %p514_p12, %s3567_s21, 1 }
  0x23   : > { %s3732_s26 = scalar_select %p519_p13, %s3563_s20, 1 }
  0x24   : > { %s2948_s12 = sshll.u32 %s515_s25, 6  ;;  %s2895_s13 = sshll.u32 %s515_s25, 1 }
  0x25   : > { %s3737_s23 = scalar_lea.vmem %s5012_s0, %s2948_s12  ;;  %s2949_s24 = sshll.u32 %s3732_s26, 4 }
  0x26   : > { %s3751_s18 = scalar_lea.vmem %s5013_s3, %s2949_s24  ;;  %s3213_s25 = smul.u32 72, %s3732_s26 }
  0x27   : > { %s2950_s28 = sshll.u32 %s3732_s26, 5  ;;  %s545_s24 = scalar_lea.vmem %s4946_s7, %s3732_s26 }
  0x28   : > { %s3762_s22 = scalar_lea.vmem %s4943_s4, %s3213_s25  ;;  %s3767_s30 = scalar_lea.vmem %s4945_s6, %s2950_s28 }
  0x29   : > { %s3214_s29 = smul.u32 288, %s3732_s26  ;;  %s553_s20 = scalar_lea.vmem %s4948_s9, %s3732_s26 }
  0x2a   : > { %s3781_s0 = scalar_lea.vmem %s4950_s11, %s2895_s13  ;;  %s3788_s28 = scalar_lea.vmem [#allocation3], %s2886_s16 }
  0x2b   : > { %s3786_s15 = scalar_lea.vmem %s4947_s8, %s3214_s29  ;;  %p2896_p0 = scmp.ne.s32.totalorder %s5014_s19, 0 }
  0x2c   : > { %v562_v0 = vld [vmem:[%s3737_s23] sm:$0xff] (!%p2896_p0)  ;;  %vm570_vm0 = vcmask (!%p2896_p0), 130048   ;;  %v563_v1 = vld [vmem:[%s3737_s23 + $0x8] sm:$0xff] (!%p2896_p0)  ;;  %v564_v2 = vld [vmem:[%s3737_s23 + $0x10] sm:$0xff] (!%p2896_p0)  ;;  %vm579_vm1 = vcmask (!%p2896_p0), 0   ;;  %v3581_v6 = vmov (!%p2896_p0), 0.0  }
  0x2d   : > { %561 = sbr.rel (%p2896_p0) target bundleno = 52 (0x34), region = 64  ;;  %571 = vst.msk [vmem:[%s3788_s28] sm:$0xff] (!%p2896_p0), %vm570_vm0, %v562_v0  ;;  %572 = vst.msk [vmem:[%s3788_s28 + $0x8] sm:$0xff] (!%p2896_p0), %vm570_vm0, %v563_v1  ;;  %v565_v3 = vld [vmem:[%s3737_s23 + $0x18] sm:$0xff] (!%p2896_p0)  ;;  %v566_v4 = vld [vmem:[%s3737_s23 + $0x20] sm:$0xff] (!%p2896_p0) }
  0x2e   : > { %573 = vst.msk [vmem:[%s3788_s28 + $0x10] sm:$0xff] (!%p2896_p0), %vm570_vm0, %v564_v2  ;;  %v567_v5 = vld [vmem:[%s3737_s23 + $0x28] sm:$0xff] (!%p2896_p0)  ;;  %574 = vst.msk [vmem:[%s3788_s28 + $0x18] sm:$0xff] (!%p2896_p0), %vm570_vm0, %v565_v3  ;;  %v568_v7 = vld [vmem:[%s3737_s23 + $0x30] sm:$0xff] (!%p2896_p0) }
  0x2f   : > { %580 = vst.msk [vmem:[#allocation2] sm:$0x1] (!%p2896_p0), %vm579_vm1, %v3581_v6  ;;  %v569_v8 = vld [vmem:[%s3737_s23 + $0x38] sm:$0xff] (!%p2896_p0) }
  0x30   : > { %575 = vst.msk [vmem:[%s3788_s28 + $0x20] sm:$0xff] (!%p2896_p0), %vm570_vm0, %v566_v4  ;;  %576 = vst.msk [vmem:[%s3788_s28 + $0x28] sm:$0xff] (!%p2896_p0), %vm570_vm0, %v567_v5 }
  0x31   : > { %577 = vst.msk [vmem:[%s3788_s28 + $0x30] sm:$0xff] (!%p2896_p0), %vm570_vm0, %v568_v7  ;;  %578 = vst.msk [vmem:[%s3788_s28 + $0x38] sm:$0xff] (!%p2896_p0), %vm570_vm0, %v569_v8 }
  0x34 PF: > { %v636_v9 = vld [vmem:[%s3751_s18] sm:$0xff]  ;;  %v637_v10 = vld [vmem:[%s3751_s18 + $0x8] sm:$0xff]  ;;  %s5015_s23 = scalar_lea.vmem %s4940_s1, %s3732_s26  ;;  %s5016_s13 = scalar_lea.vmem %s4941_s2, %s3732_s26  ;;  %v4989_v16 = vmov 0.0   ;;  %vm4968_vm2 = vcmask 130048   ;;  %v581_v39 = vlaneseq  ;;  %vm4967_vm3 = vcmask 1046528  }
  0x35   : > { %v598_v11 = vld [vmem:[%s3788_s28] sm:$0xff]  ;;  %v3145_v12 = vpack.c.bf16 %v637_v10, %v636_v9  ;;  %v2897_v13 = vld [vmem:[%s5015_s23] ss:$0 sm:$0xff]  ;;  %v599_v15 = vld [vmem:[%s3788_s28 + $0x8] sm:$0xff]  ;;  %s3583_s27 = smov 16   ;;  %s3584_s18 = smov 8  }
  0x36   : > { %v2898_v14 = vld [vmem:[%s5016_s13] ss:$0 sm:$0xff]  ;;  %1122 = vrot.lane.b32.xlu1 %v4989_v16, %s3583_s27  ;;  %v613_v17 = vadd.f32 %v2897_v13, %v598_v11  ;;  %v614_v18 = vadd.f32 %v2897_v13, %v599_v15  ;;  %v600_v19 = vld [vmem:[%s3788_s28 + $0x10] sm:$0xff]  ;;  %1090 = vrot.lane.b32.xlu0 %v4989_v16, %s3584_s18  ;;  %s3585_s10 = smov 48   ;;  %v3849_v40 = vshrl.u32 %v581_v39, 7  ;;  %s3586_s29 = smov 32  }
  0x37   : > { %v601_v20 = vld [vmem:[%s3788_s28 + $0x18] sm:$0xff]  ;;  %v602_v21 = vld [vmem:[%s3788_s28 + $0x20] sm:$0xff]  ;;  %3146 = vmatprep.subr.bf16.mxu1 %v3145_v12  ;;  %v615_v22 = vadd.f32 %v2897_v13, %v600_v19  ;;  %v603_v27 = vld [vmem:[%s3788_s28 + $0x28] sm:$0xff]  ;;  %vm4966_vm4 = vcmask 1040384   ;;  %s3587_s21 = smov 56   ;;  %v5017_v58 = vmov 0  ;;  %s5074_s17 = scalar_lea.vmem %s4944_s5, %s3732_s26 }
  0x38   : > { %v616_v23 = vadd.f32 %v2897_v13, %v601_v20  ;;  %3148 = vmatpush3.bf16.msra.mxu1 %v3145_v12  ;;  %v628_v24 = vmul.f32 %v2898_v14, %v613_v17  ;;  %v629_v25 = vmul.f32 %v2898_v14, %v614_v18  ;;  %v617_v26 = vadd.f32 %v2897_v13, %v602_v21  ;;  %v604_v29 = vld [vmem:[%s3788_s28 + $0x30] sm:$0xff]  ;;  %v605_v34 = vld [vmem:[%s3788_s28 + $0x38] sm:$0xff]  ;;  %s3588_s25 = smov 24   ;;  %s3589_s12 = smov 40  }
  0x39   : > { %v630_v28 = vmul.f32 %v2898_v14, %v615_v22  ;;  %v618_v31 = vadd.f32 %v2897_v13, %v603_v27  ;;  %v619_v33 = vadd.f32 %v2897_v13, %v604_v29  ;;  %v620_v36 = vadd.f32 %v2897_v13, %v605_v34  ;;  %s3592_s26 = smov 120  }
  0x3a   : > { %1256 = vrot.lane.b32.xlu1 %v4989_v16, %s3585_s10  ;;  %3063 = vmatprep.mubr.msk.f32.mxu1 %vm4968_vm2, %v628_v24  ;;  %v631_v30 = vmul.f32 %v2898_v14, %v616_v23  ;;  %v632_v32 = vmul.f32 %v2898_v14, %v617_v26  ;;  %v583_v42 = vadd.s32 8, %v3849_v40  ;;  %v590_v7 = vand.u32 7, %v3849_v40  ;;  %v768_v24 = vld [vmem:[%s3762_s22] sm:$0xff] }
  0x3b   : > { %3064 = vmatmul.mubr.msk.f32.vlgmr.msra.gmra.mrb[0].mxu1 %vm4968_vm2, %v629_v25  ;;  %v633_v35 = vmul.f32 %v2898_v14, %v618_v31  ;;  %v634_v37 = vmul.f32 %v2898_v14, %v619_v33  ;;  %v635_v38 = vmul.f32 %v2898_v14, %v620_v36  ;;  %v5021_v17 = vmov 0  ;;  %v769_v25 = vld [vmem:[%s3762_s22 + $0x8] sm:$0xff]  ;;  %v771_v33 = vld [vmem:[%s3762_s22 + $0x18] sm:$0xff] }
  0x3c   : > { %3066 = vmatprep.mubr.msk.f32.mxu1 %vm4968_vm2, %v630_v28  ;;  %v591_v49 = vand.u32 7, %v583_v42  ;;  %vm3944_vm7 = vcmp.ge.s32.totalorder %v590_v7, 1  ;;  %vm3948_vm8 = vcmp.lt.s32.totalorder %v590_v7, 7  ;;  %v773_v36 = vld [vmem:[%s3762_s22 + $0x28] sm:$0xff]  ;;  %v584_v39 = vadd.s32 16, %v3849_v40  ;;  %v774_v42 = vld [vmem:[%s3762_s22 + $0x30] sm:$0xff] }
  0x3d   : > { %v5022_v17 = vsel %vm3944_vm7, 4294967295, %v5021_v17 }
  0x3e   : > { %vm3882_vm5 = vcmp.lt.s32.totalorder %v591_v49, 7  ;;  %vm3915_vm6 = vcmp.ge.s32.totalorder %v591_v49, 1 }
  0x3f   : > { %3067 = vmatmul.mubr.msk.f32.gmra.mrb[2].mxu1 %vm4968_vm2, %v631_v30  ;;  %v5018_v58 = vsel %vm3882_vm5, 4294967295, %v5017_v58  ;;  %v3149_v30 = vpack.c.bf16 %v769_v25, %v768_v24 }
  0x40   : > { %3069 = vmatprep.mubr.msk.f32.mxu1 %vm4968_vm2, %v632_v32  ;;  %v770_v32 = vld [vmem:[%s3762_s22 + $0x10] sm:$0xff] }
  0x41   : > { %3150 = vmatprep.subr.bf16.mxu0 %v3149_v30  ;;  %v3153_v34 = vpack.c.bf16 %v771_v33, %v770_v32  ;;  %v5035_v32 = vmov 0 }
  0x42   : > { %3152 = vmatpush3.bf16.msra.mxu0 %v3149_v30 }
  0x43   : > { %3070 = vmatmul.mubr.msk.f32.gmra.mrb[4].mxu1 %vm4968_vm2, %v633_v35  ;;  %3154 = vmatprep.subr.bf16.mxu0 %v3153_v34  ;;  %v772_v35 = vld [vmem:[%s3762_s22 + $0x20] sm:$0xff] }
  0x44   : > { %3072 = vmatprep.mubr.msk.f32.mxu1 %vm4968_vm2, %v634_v37  ;;  %v3157_v37 = vpack.c.bf16 %v773_v36, %v772_v35 }
  0x46   : > { %3156 = vmatpush3.bf16.msra.mxu0 %v3153_v34 }
  0x47   : > { %3073 = vmatmul.mubr.msk.f32.gmra.mrb[6].mxu1 %vm4968_vm2, %v635_v38  ;;  %v585_v38 = vadd.s32 24, %v3849_v40  ;;  %3158 = vmatprep.subr.bf16.mxu0 %v3157_v37 }
  0x4a   : > { %3160 = vmatpush3.bf16.msra.mxu0 %v3157_v37 }
 0x10e   : > { %v3851_v41 = vpop.f32.mrb[0].mxu1 }
 0x10f   : > { %1180 = vrot.lane.b32.xlu0 %v3851_v41, %s3586_s29  ;;  %1094 = vrot.lane.b32.xlu1 %v3851_v41, %s3584_s18  ;;  %v3858_v43 = vpop.f32.mrb[1].mxu1  ;;  %v875_v44 = vrot.slane %v3851_v41, 1  ;;  %v787_v45 = vrot.slane %v3851_v41, 7 }
 0x110   : > { %v874_v46 = vrot.slane %v3858_v43, 1  ;;  %v786_v47 = vrot.slane %v3858_v43, 7 }
 0x112   : > { %v3864_v48 = vpop.f32.mrb[2].mxu1  ;;  %v876_v50 = vsel %vm4967_vm3, %v874_v46, %v875_v44  ;;  %v3868_v51 = vsel %vm4966_vm4, %v786_v47, %v787_v45  ;;  %v3942_v15 = vsel %vm4966_vm4, 0.0, %v786_v47  ;;  %v593_v46 = vand.u32 7, %v585_v38 }
 0x113   : > { %1273 = vrot.lane.b32.xlu1 %v3851_v41, %s3587_s21  ;;  %1092 = vrot.lane.b32.xlu0 %v3858_v43, %s3584_s18  ;;  %v3874_v52 = vpop.f32.mrb[3].mxu1  ;;  %v879_v54 = vrot.slane %v3864_v48, 1  ;;  %v791_v56 = vrot.slane %v3864_v48, 7  ;;  %v931_v0 = vsel %vm3882_vm5, %v876_v50, 0.0  ;;  %v958_v14 = vsel %vm3915_vm6, %v3868_v51, 0.0 }
 0x114   : > { %v877_v53 = vrot.slane %v3874_v52, 1  ;;  %v789_v55 = vrot.slane %v3874_v52, 7  ;;  %v957_v26 = vsel %vm3944_vm7, %v3942_v15, 0.0  ;;  %v983_v27 = vsel %vm3948_vm8, %v876_v50, 0.0 }
 0x115   : > { %v1025_v31 = vsel %vm3944_vm7, %v3868_v51, 0.0  ;;  %v592_v47 = vand.u32 7, %v584_v39  ;;  %vm4006_vm9 = vcmp.lt.s32.totalorder %v593_v46, 7  ;;  %v5025_v50 = vmov 0 }
 0x116   : > { %v3880_v57 = vpop.f32.mrb[4].mxu1  ;;  %v3887_v59 = vsel %vm4967_vm3, %v875_v44, %v877_v53  ;;  %v3890_v60 = vsel %vm4967_vm3, %v877_v53, %v879_v54  ;;  %v3899_v62 = vsel %vm4966_vm4, %v787_v45, %v789_v55  ;;  %v3902_v63 = vsel %vm4966_vm4, %v789_v55, %v791_v56  ;;  %v775_v44 = vld [vmem:[%s3762_s22 + $0x38] sm:$0xff] }
 0x117   : > { %1178 = vrot.lane.b32.xlu0 %v3858_v43, %s3586_s29  ;;  %1098 = vrot.lane.b32.xlu1 %v3864_v48, %s3584_s18  ;;  %v3896_v61 = vpop.f32.mrb[5].mxu1  ;;  %v883_v3 = vrot.slane %v3880_v57, 1  ;;  %v795_v5 = vrot.slane %v3880_v57, 7  ;;  %v3161_v45 = vpack.c.bf16 %v775_v44, %v774_v42  ;;  %v984_v49 = vsel %vm3882_vm5, %v3887_v59, 0.0 }
 0x118   : > { %v881_v2 = vrot.slane %v3896_v61, 1  ;;  %v793_v4 = vrot.slane %v3896_v61, 7  ;;  %v5026_v50 = vsel %vm4006_vm9, 4294967295, %v5025_v50  ;;  %vm4010_vm10 = vcmp.lt.s32.totalorder %v592_v47, 7 }
 0x119   : > { %3162 = vmatprep.subr.bf16.mxu0 %v3161_v45  ;;  %v5027_v53 = vmov 0  ;;  %v933_v55 = vsel %vm4006_vm9, %v3890_v60, 0.0  ;;  %vm4023_vm11 = vcmp.ge.s32.totalorder %v592_v47, 1  ;;  %vm4035_vm12 = vcmp.ge.s32.totalorder %v593_v46, 1 }
 0x11a   : > { %v3906_v1 = vpop.f32.mrb[6].mxu1  ;;  %v3923_v9 = vsel %vm4967_vm3, %v879_v54, %v881_v2  ;;  %v3926_v10 = vsel %vm4967_vm3, %v881_v2, %v883_v3  ;;  %v3929_v11 = vsel %vm4966_vm4, %v791_v56, %v793_v4  ;;  %v3932_v12 = vsel %vm4966_vm4, %v793_v4, %v795_v5  ;;  %v776_v54 = vld [vmem:[%s3762_s22 + $0x40] sm:$0xff]  ;;  %3164 = vmatpush3.bf16.msra.mxu0 %v3161_v45  ;;  %s3590_s22 = smov 64  }
 0x11b   : > { %1184 = vrot.lane.b32.xlu0 %v3864_v48, %s3586_s29  ;;  %1124 = vrot.lane.b32.xlu1 %v931_v0, %s3583_s27  ;;  %v3920_v8 = vpop.f32.mrb[7].mxu1  ;;  %v887_v13 = vrot.slane %v3906_v1, 1  ;;  %v938_v21 = vrot.slane %v3906_v1, 7  ;;  %v5028_v53 = vsel %vm4010_vm10, 4294967295, %v5027_v53  ;;  %v932_v56 = vsel %vm4010_vm10, %v3887_v59, 0.0 }
 0x11c   : > { %v885_v19 = vrot.slane %v3920_v8, 1  ;;  %v797_v20 = vrot.slane %v3920_v8, 7  ;;  %3091 = vmatprep.subr.mxu0 %v776_v54  ;;  %v1026_v2 = vsel %vm3915_vm6, %v3899_v62, 0.0  ;;  %v1075_v7 = vsel %vm3948_vm8, %v3887_v59, 0.0 }
 0x11d   : > { %v1027_v59 = vsel %vm4023_vm11, %v3902_v63, 0.0  ;;  %v986_v24 = vsel %vm4006_vm9, %v3923_v9, 0.0  ;;  %v1028_v30 = vsel %vm4035_vm12, %v3929_v11, 0.0  ;;  %v589_v38 = vadd.s32 56, %v3849_v40 }
 0x11e   : > { %v3956_v22 = vsel %vm4967_vm3, %v883_v3, %v885_v19  ;;  %v3961_v23 = vsel %vm4967_vm3, %v885_v19, %v887_v13  ;;  %v3971_v28 = vsel %vm4966_vm4, %v795_v5, %v797_v20  ;;  %v3976_v29 = vsel %vm4966_vm4, %v797_v20, %v938_v21  ;;  %3092 = vmatpush3.msra.mxu0 %v776_v54 }
 0x11f   : > { %1277 = vrot.lane.b32.xlu0 %v3864_v48, %s3587_s21  ;;  %1156 = vrot.lane.b32.xlu1 %v958_v14, %s3588_s25  ;;  %v959_v3 = vsel %vm4023_vm11, %v3899_v62, 0.0  ;;  %v960_v5 = vsel %vm4035_vm12, %v3902_v63, 0.0  ;;  %v1076_v14 = vsel %vm3882_vm5, %v3890_v60, 0.0  ;;  %v985_v19 = vsel %vm4010_vm10, %v3890_v60, 0.0 }
 0x120   : > { %v586_v60 = vadd.s32 32, %v3849_v40  ;;  %v587_v20 = vadd.s32 40, %v3849_v40  ;;  %v1077_v21 = vsel %vm4010_vm10, %v3923_v9, 0.0  ;;  %v597_v42 = vand.u32 7, %v589_v38 }
 0x121   : > { %v5041_v45 = vmov 0  ;;  %v588_v47 = vadd.s32 48, %v3849_v40  ;;  %vm4992_vm10 = vcmask 523264   ;;  %vm5052_vm5 = vcmask 261120  }
 0x122   : > { %v594_v25 = vand.u32 7, %v586_v60  ;;  %vm4132_vm1 = vcmp.lt.s32.totalorder %v597_v42, 7  ;;  %vm4177_vm2 = vcmp.ge.s32.totalorder %v597_v42, 1  ;;  %vm4991_vm7 = vcmask 588800  }
 0x123   : > { %1154 = vrot.lane.b32.xlu0 %v957_v26, %s3588_s25  ;;  %1210 = vrot.lane.b32.xlu1 %v983_v27, %s3589_s12  ;;  %v595_v26 = vand.u32 7, %v587_v20  ;;  %v1078_v27 = vsel %vm4006_vm9, %v3926_v10, 0.0  ;;  %v5042_v45 = vsel %vm4132_vm1, 4294967295, %v5041_v45  ;;  %v1091_v20 = vpop.permute.xlu0 %1090  ;;  %vm1363_vm9 = vcmask 326656  }
 0x124   : > { %vm4087_vm13 = vcmp.lt.s32.totalorder %v594_v25, 7  ;;  %vm4103_vm15 = vcmp.ge.s32.totalorder %v594_v25, 1 }
 0x125   : > { %vm4091_vm14 = vcmp.lt.s32.totalorder %v595_v26, 7  ;;  %v934_v33 = vsel %vm4087_vm13, %v3923_v9, 0.0  ;;  %vm4107_vm0 = vcmp.ge.s32.totalorder %v595_v26, 1  ;;  %v961_v9 = vsel %vm4103_vm15, %v3929_v11, 0.0 }
 0x126   : > { %v5036_v32 = vsel %vm4091_vm14, 4294967295, %v5035_v32  ;;  %v935_v34 = vsel %vm4091_vm14, %v3926_v10, 0.0  ;;  %v962_v37 = vsel %vm4107_vm0, %v3932_v12, 0.0  ;;  %v987_v39 = vsel %vm4087_vm13, %v3926_v10, 0.0 }
 0x127   : > { %1096 = vrot.lane.b32.xlu0 %v3874_v52, %s3584_s18  ;;  %1242 = vrot.lane.b32.xlu1 %v1025_v31, %s3585_s10  ;;  %v5033_v31 = vmov 0  ;;  %v1029_v44 = vsel %vm4103_vm15, %v3932_v12, 0.0  ;;  %v966_v10 = vsel %vm4967_vm3, %v887_v13, 0.0  ;;  %v988_v54 = vsel %vm4091_vm14, %v3956_v22, 0.0 }
 0x128   : > { %v5034_v31 = vsel %vm4087_vm13, 4294967295, %v5033_v31  ;;  %v990_v46 = vsel %vm4132_vm1, %v966_v10, 0.0  ;;  %v596_v13 = vand.u32 7, %v588_v47 }
 0x12a   : > { %vm4161_vm4 = vcmp.lt.s32.totalorder %v596_v13, 7  ;;  %vm4173_vm3 = vcmp.ge.s32.totalorder %v596_v13, 1 }
 0x12b   : > { %1275 = vrot.lane.b32.xlu0 %v3874_v52, %s3587_s21  ;;  %1182 = vrot.lane.b32.xlu1 %v3874_v52, %s3586_s29  ;;  %v989_v26 = vsel %vm4161_vm4, %v3961_v23, 0.0 }
 0x12f   : > { %1281 = vrot.lane.b32.xlu0 %v3880_v57, %s3587_s21  ;;  %1188 = vrot.lane.b32.xlu1 %v3880_v57, %s3586_s29 }
 0x133   : > { %1212 = vrot.lane.b32.xlu0 %v984_v49, %s3589_s12  ;;  %1102 = vrot.lane.b32.xlu1 %v3880_v57, %s3584_s18  ;;  %v1079_v49 = vsel %vm4087_vm13, %v3956_v22, 0.0  ;;  %vm4982_vm13 = vcmask 261120  }
 0x137   : > { %1128 = vrot.lane.b32.xlu0 %v933_v55, %s3583_s27  ;;  %1126 = vrot.lane.b32.xlu1 %v932_v56, %s3583_s27  ;;  %v1080_v55 = vsel %vm4091_vm14, %v3961_v23, 0.0  ;;  %v1030_v56 = vsel %vm4107_vm0, %v3971_v28, 0.0  ;;  %vm5049_vm14 = vcmask 130048  }
 0x13b   : > { %1244 = vrot.lane.b32.xlu0 %v1026_v2, %s3585_s10  ;;  %1158 = vrot.lane.b32.xlu1 %v959_v3, %s3588_s25  ;;  %v5043_v2 = vmov 0  ;;  %v1123_v3 = vpop.permute.xlu1 %1122 }
 0x13c   : > { %v5044_v2 = vsel %vm4161_vm4, 4294967295, %v5043_v2 }
 0x13f   : > { %1160 = vrot.lane.b32.xlu0 %v960_v5, %s3588_s25  ;;  %1304 = vrot.lane.b32.xlu1 %v1075_v7, %s3590_s22  ;;  %v936_v5 = vsel %vm4161_vm4, %v3956_v22, 0.0  ;;  %v937_v7 = vsel %vm4132_vm1, %v3961_v23, 0.0  ;;  %v963_v22 = vsel %vm4173_vm3, %v3971_v28, 0.0  ;;  %v4189_v60 = vpop.permute.xlu1 %1256  ;;  %vm1328_vm1 = vcmask 64512  }
 0x143   : > { %1306 = vrot.lane.b32.xlu0 %v1076_v14, %s3590_s22  ;;  %1214 = vrot.lane.b32.xlu1 %v985_v19, %s3589_s12  ;;  %v5045_v14 = vmov 0 }
 0x144   : > { %v5046_v14 = vsel %vm4173_vm3, 4294967295, %v5045_v14 }
 0x147   : > { %1246 = vrot.lane.b32.xlu0 %v1027_v59, %s3585_s10  ;;  %1279 = vrot.lane.b32.xlu1 %v3896_v61, %s3587_s21  ;;  %v964_v59 = vsel %vm4177_vm2, %v3976_v29, 0.0 }
 0x14b   : > { %1186 = vrot.lane.b32.xlu0 %v3896_v61, %s3586_s29  ;;  %1100 = vrot.lane.b32.xlu1 %v3896_v61, %s3584_s18 }
 0x14f   : > { %1285 = vrot.lane.b32.xlu0 %v3906_v1, %s3587_s21  ;;  %1192 = vrot.lane.b32.xlu1 %v3906_v1, %s3586_s29 }
 0x153   : > { %1308 = vrot.lane.b32.xlu0 %v1077_v21, %s3590_s22  ;;  %1216 = vrot.lane.b32.xlu1 %v986_v24, %s3589_s12  ;;  %v1543_v21 = vld [vmem:[%s3767_s30] sm:$0xff]  ;;  %v1544_v24 = vld [vmem:[%s3767_s30 + $0x8] sm:$0xff] }
 0x154   : > { %v4193_v25 = vpack.c.bf16 %v1544_v24, %v1543_v21  ;;  %v849_v21 = vsel %vm4173_vm3, %v3932_v12, 0.0 }
 0x156   : > { %3166 = vmatprep.subr.bf16.mxu0 %v4193_v25 }
 0x157   : > { %1310 = vrot.lane.b32.xlu0 %v1078_v27, %s3590_s22  ;;  %1248 = vrot.lane.b32.xlu1 %v1028_v30, %s3585_s10 }
 0x15b   : > { %1130 = vrot.lane.b32.xlu0 %v934_v33, %s3583_s27  ;;  %1132 = vrot.lane.b32.xlu1 %v935_v34, %s3583_s27  ;;  %v1031_v33 = vsel %vm4173_vm3, %v3976_v29, 0.0  ;;  %vm5051_vm3 = vcmask 195584  }
 0x15f   : > { %1162 = vrot.lane.b32.xlu0 %v961_v9, %s3588_s25  ;;  %1164 = vrot.lane.b32.xlu1 %v962_v37, %s3588_s25  ;;  %v1081_v9 = vsel %vm4161_vm4, %v966_v10, 0.0  ;;  %v1329_v10 = vsel %vm1328_vm1, 0.0, %v1091_v20  ;;  %vm4979_vm4 = vcmask 195584  }
 0x163   : > { %1218 = vrot.lane.b32.xlu0 %v987_v39, %s3589_s12  ;;  %1283 = vrot.lane.b32.xlu1 %v3920_v8, %s3587_s21 }
 0x167   : > { %1250 = vrot.lane.b32.xlu0 %v1029_v44, %s3585_s10  ;;  %1104 = vrot.lane.b32.xlu1 %v3920_v8, %s3584_s18 }
 0x16b   : > { %1190 = vrot.lane.b32.xlu0 %v3920_v8, %s3586_s29  ;;  %1224 = vrot.lane.b32.xlu1 %v990_v46, %s3589_s12 }
 0x16f   : > { %1312 = vrot.lane.b32.xlu0 %v1079_v49, %s3590_s22  ;;  %1220 = vrot.lane.b32.xlu1 %v988_v54, %s3589_s12 }
 0x173   : > { %1314 = vrot.lane.b32.xlu0 %v1080_v55, %s3590_s22  ;;  %1252 = vrot.lane.b32.xlu1 %v1030_v56, %s3585_s10 }
 0x177   : > { %1134 = vrot.lane.b32.xlu0 %v936_v5, %s3583_s27  ;;  %1136 = vrot.lane.b32.xlu1 %v937_v7, %s3583_s27  ;;  %v1337_v7 = vsel %vm5049_vm14, %v1329_v10, %v1123_v3  ;;  %v844_v3 = vsel %vm3915_vm6, %v3942_v15, 0.0  ;;  %vm1372_vm14 = vcmask 392192  }
 0x17b   : > { %1166 = vrot.lane.b32.xlu0 %v963_v22, %s3588_s25  ;;  %1168 = vrot.lane.b32.xlu1 %v964_v59, %s3588_s25 }
 0x17f   : > { %1222 = vrot.lane.b32.xlu0 %v989_v26, %s3589_s12  ;;  %1287 = vrot.lane.b32.xlu1 %v4989_v16, %s3587_s21 }
 0x181   : > { %v1181_v27 = vpop.permute.xlu0 %1180  ;;  %v4202_v30 = vpop.permute.xlu1 %1094 }
 0x183   : > { %1254 = vrot.lane.b32.xlu0 %v1031_v33, %s3585_s10  ;;  %1318 = vrot.lane.b32.xlu1 %v4989_v16, %s3590_s22 }
 0x185   : > { %v1274_v23 = vpop.permute.xlu1 %1273  ;;  %v1093_v34 = vpop.permute.xlu0 %1092 }
 0x187   : > { %1316 = vrot.lane.b32.xlu0 %v1081_v9, %s3590_s22 }
 0x189   : > { %v1179_v37 = vpop.permute.xlu0 %1178  ;;  %v4213_v38 = vpop.permute.xlu1 %1098 }
 0x18d   : > { %v4215_v39 = vpop.permute.xlu0 %1184  ;;  %v1125_v42 = vpop.permute.xlu1 %1124 }
 0x191   : > { %v4217_v44 = vpop.permute.xlu0 %1277  ;;  %v1157_v29 = vpop.permute.xlu1 %1156 }
 0x195   : > { %v1155_v46 = vpop.permute.xlu0 %1154  ;;  %v1211_v47 = vpop.permute.xlu1 %1210 }
 0x196   : > { %v1346_v22 = vsel %vm4979_vm4, %v1337_v7, %v1155_v46  ;;  %v1330_v46 = vsel %vm1328_vm1, %v844_v3, %v1093_v34  ;;  %vm5050_vm4 = vcmask 130048  }
 0x197   : > { %v1355_v20 = vsel %vm4982_vm13, %v1346_v22, %v1179_v37  ;;  %v1338_v12 = vsel %vm5050_vm4, %v1330_v46, %v1125_v42  ;;  %vm4993_vm13 = vcmask 457728  }
 0x198   : > { %v1364_v10 = vsel %vm1363_vm9, %v1355_v20, %v1211_v47  ;;  %v1347_v7 = vsel %vm5051_vm3, %v1338_v12, %v1157_v29  ;;  %vm5053_vm3 = vmmov %vm5050_vm4  ;;  %vm5054_vm4 = vcmask 195584  }
 0x199   : > { %v1097_v49 = vpop.permute.xlu0 %1096  ;;  %v1243_v54 = vpop.permute.xlu1 %1242  ;;  %v1356_v22 = vsel %vm5052_vm5, %v1347_v7, %v1181_v27 }
 0x19a   : > { %v1373_v37 = vsel %vm1372_vm14, %v1364_v10, %v1243_v54 }
 0x19b   : > { %v1382_v47 = vsel %vm4993_vm13, %v1373_v37, %v1274_v23  ;;  %v845_v23 = vsel %vm4023_vm11, %v3868_v51, 0.0  ;;  %v846_v51 = vsel %vm4035_vm12, %v3899_v62, 0.0 }
 0x19c   : > { %v1331_v10 = vsel %vm1328_vm1, %v845_v23, %v4202_v30 }
 0x19d   : > { %v1276_v13 = vpop.permute.xlu0 %1275  ;;  %v1183_v55 = vpop.permute.xlu1 %1182 }
 0x1a1   : > { %v4220_v56 = vpop.permute.xlu0 %1281  ;;  %v4222_v5 = vpop.permute.xlu1 %1188 }
 0x1a5   : > { %v1213_v59 = vpop.permute.xlu0 %1212  ;;  %v1103_v24 = vpop.permute.xlu1 %1102 }
 0x1a6   : > { %v4230_v26 = vsel %vm1328_vm1, %v849_v21, %v1103_v24  ;;  %v1365_v15 = vsel %vm1363_vm9, %v1356_v22, %v1213_v59 }
 0x1a9   : > { %v1129_v33 = vpop.permute.xlu0 %1128  ;;  %v1127_v9 = vpop.permute.xlu1 %1126 }
 0x1aa   : > { %v1339_v12 = vsel %vm5053_vm3, %v1331_v10, %v1127_v9  ;;  %v1332_v9 = vsel %vm1328_vm1, %v846_v51, %v1097_v49  ;;  %v847_v51 = vsel %vm4103_vm15, %v3902_v63, 0.0 }
 0x1ad   : > { %v1245_v21 = vpop.permute.xlu0 %1244  ;;  %v1159_v24 = vpop.permute.xlu1 %1158 }
 0x1ae   : > { %v1374_v20 = vsel %vm1372_vm14, %v1365_v15, %v1245_v21 }
 0x1af   : > { %v1383_v54 = vsel %vm4993_vm13, %v1374_v20, %v1276_v13  ;;  %v1348_v13 = vsel %vm5054_vm4, %v1339_v12, %v1159_v24  ;;  %v1340_v24 = vsel %vm5053_vm3, %v1332_v9, %v1129_v33 }
 0x1b0   : > { %v1357_v37 = vsel %vm5052_vm5, %v1348_v13, %v1183_v55 }
 0x1b1   : > { %v1161_v16 = vpop.permute.xlu0 %1160  ;;  %v1305_v34 = vpop.permute.xlu1 %1304 }
 0x1b2   : > { %v1391_v42 = vsel %vm4992_vm10, %v1382_v47, %v1305_v34  ;;  %v1349_v34 = vsel %vm5054_vm4, %v1340_v24, %v1161_v16 }
 0x1b3   : > { %3093 = vmatprep.mubr.msk.f32.mxu0 %vm4991_vm7, %v1391_v42  ;;  %v1358_v62 = vsel %vm5052_vm5, %v1349_v34, %v4215_v39 }
 0x1b5   : > { %v1307_v29 = vpop.permute.xlu0 %1306  ;;  %v1215_v3 = vpop.permute.xlu1 %1214 }
 0x1b6   : > { %v1392_v46 = vsel %vm4992_vm10, %v1383_v54, %v1307_v29  ;;  %v1366_v22 = vsel %vm1363_vm9, %v1357_v37, %v1215_v3 }
 0x1b7   : > { %3094 = vmatmul.mubr.msk.f32.vlgmr.msra.gmra.mrb[0].mxu0 %vm4991_vm7, %v1392_v46 }
 0x1b8   : > { %3168 = vmatpush3.bf16.msra.mxu0 %v4193_v25 }
 0x1b9   : > { %v1247_v27 = vpop.permute.xlu0 %1246  ;;  %v1280_v59 = vpop.permute.xlu1 %1279 }
 0x1ba   : > { %v1375_v30 = vsel %vm1372_vm14, %v1366_v22, %v1247_v27  ;;  %v848_v27 = vsel %vm4107_vm0, %v3929_v11, 0.0  ;;  %v1333_v11 = vsel %vm1328_vm1, %v847_v51, %v4213_v38 }
 0x1bb   : > { %v1384_v55 = vsel %vm4993_vm13, %v1375_v30, %v4217_v44 }
 0x1bd   : > { %v1187_v7 = vpop.permute.xlu0 %1186  ;;  %v1101_v21 = vpop.permute.xlu1 %1100 }
 0x1be   : > { %v1334_v39 = vsel %vm1328_vm1, %v848_v27, %v1101_v21 }
 0x1c1   : > { %v4260_v25 = vpop.permute.xlu0 %1285  ;;  %v4262_v15 = vpop.permute.xlu1 %1192 }
 0x1c5   : > { %v1309_v47 = vpop.permute.xlu0 %1308  ;;  %v1217_v20 = vpop.permute.xlu1 %1216 }
 0x1c6   : > { %v1393_v42 = vsel %vm4992_vm10, %v1384_v55, %v1309_v47  ;;  %v1367_v29 = vsel %vm1363_vm9, %v1358_v62, %v1217_v20 }
 0x1c7   : > { %3096 = vmatprep.mubr.msk.f32.mxu0 %vm4991_vm7, %v1393_v42 }
 0x1c9   : > { %v1311_v54 = vpop.permute.xlu0 %1310  ;;  %v1249_v49 = vpop.permute.xlu1 %1248 }
 0x1ca   : > { %v1376_v33 = vsel %vm1372_vm14, %v1367_v29, %v1249_v49 }
 0x1cb   : > { %v1385_v16 = vsel %vm4993_vm13, %v1376_v33, %v1280_v59 }
 0x1cc   : > { %v1394_v3 = vsel %vm4992_vm10, %v1385_v16, %v1311_v54  ;;  %vm5056_vm10 = vmmov %vm5054_vm4 }
 0x1cd   : > { %v1131_v46 = vpop.permute.xlu0 %1130  ;;  %v1133_v44 = vpop.permute.xlu1 %1132  ;;  %3097 = vmatmul.mubr.msk.f32.gmra.mrb[2].mxu0 %vm4991_vm7, %v1394_v3  ;;  %vm5055_vm7 = vmmov %vm5053_vm3 }
 0x1ce   : > { %v1342_v23 = vsel %vm5053_vm3, %v1334_v39, %v1133_v44  ;;  %v1341_v21 = vsel %vm5055_vm7, %v1333_v11, %v1131_v46  ;;  %vm5057_vm3 = vmmov %vm5052_vm5  ;;  %vm5059_vm7 = vcmask 588800  }
 0x1d1   : > { %v1163_v10 = vpop.permute.xlu0 %1162  ;;  %v1165_v12 = vpop.permute.xlu1 %1164 }
 0x1d2   : > { %v1351_v13 = vsel %vm5054_vm4, %v1342_v23, %v1165_v12  ;;  %v1350_v30 = vsel %vm5056_vm10, %v1341_v21, %v1163_v10  ;;  %vm5058_vm4 = vcmask 523264  }
 0x1d3   : > { %v1360_v59 = vsel %vm5052_vm5, %v1351_v13, %v4222_v5  ;;  %v1359_v34 = vsel %vm5057_vm3, %v1350_v30, %v1187_v7  ;;  %vm5060_vm10 = vmmov %vm5058_vm4  ;;  %vm5062_vm3 = vcmask 130048  }
 0x1d4   : > { %vm5061_vm5 = vmmov %vm5059_vm7 }
 0x1d5   : > { %v1219_v37 = vpop.permute.xlu0 %1218  ;;  %v1284_v22 = vpop.permute.xlu1 %1283 }
 0x1d6   : > { %v1368_v47 = vsel %vm1363_vm9, %v1359_v34, %v1219_v37 }
 0x1d9   : > { %v1251_v9 = vpop.permute.xlu0 %1250  ;;  %v1105_v24 = vpop.permute.xlu1 %1104 }
 0x1da   : > { %v1377_v20 = vsel %vm1372_vm14, %v1368_v47, %v1251_v9 }
 0x1db   : > { %v1386_v63 = vsel %vm4993_vm13, %v1377_v20, %v4220_v56  ;;  %v850_v56 = vsel %vm4177_vm2, %v3971_v28, 0.0  ;;  %v1546_v20 = vld [vmem:[%s3767_s30 + $0x18] sm:$0xff] }
 0x1dc   : > { %v1336_v44 = vsel %vm1328_vm1, %v850_v56, %v1105_v24 }
 0x1dd   : > { %v1191_v5 = vpop.permute.xlu0 %1190  ;;  %v1225_v55 = vpop.permute.xlu1 %1224 }
 0x1e1   : > { %v1313_v42 = vpop.permute.xlu0 %1312  ;;  %v1221_v62 = vpop.permute.xlu1 %1220 }
 0x1e2   : > { %v1395_v38 = vsel %vm5058_vm4, %v1386_v63, %v1313_v42  ;;  %v1369_v29 = vsel %vm1363_vm9, %v1360_v59, %v1221_v62  ;;  %vm5063_vm4 = vcmask 195584  }
 0x1e3   : > { %3099 = vmatprep.mubr.msk.f32.mxu0 %vm5059_vm7, %v1395_v38  ;;  %vm5064_vm7 = vmmov %vm5062_vm3 }
 0x1e5   : > { %v1315_v54 = vpop.permute.xlu0 %1314  ;;  %v1253_v49 = vpop.permute.xlu1 %1252 }
 0x1e6   : > { %v1378_v7 = vsel %vm1372_vm14, %v1369_v29, %v1253_v49 }
 0x1e7   : > { %v1387_v33 = vsel %vm4993_vm13, %v1378_v7, %v1284_v22  ;;  %vm5066_vm13 = vcmask 261120  }
 0x1e8   : > { %v1396_v16 = vsel %vm5060_vm10, %v1387_v33, %v1315_v54  ;;  %vm5065_vm10 = vmmov %vm5063_vm4 }
 0x1e9   : > { %v1135_v3 = vpop.permute.xlu0 %1134  ;;  %v1137_v46 = vpop.permute.xlu1 %1136  ;;  %3100 = vmatmul.mubr.msk.f32.gmra.mrb[4].mxu0 %vm5061_vm5, %v1396_v16  ;;  %vm5067_vm5 = vmmov %vm5066_vm13 }
 0x1ea   : > { %v1344_v27 = vsel %vm5062_vm3, %v1336_v44, %v1137_v46  ;;  %v1343_v12 = vsel %vm5064_vm7, %v4230_v26, %v1135_v3 }
 0x1ed   : > { %v1167_v39 = vpop.permute.xlu0 %1166  ;;  %v1169_v23 = vpop.permute.xlu1 %1168 }
 0x1ee   : > { %v1353_v10 = vsel %vm5063_vm4, %v1344_v27, %v1169_v23  ;;  %v1352_v13 = vsel %vm5065_vm10, %v1343_v12, %v1167_v39  ;;  %vm5070_vm4 = vcmask 523264   ;;  %vm5072_vm10 = vcmask 588800  }
 0x1ef   : > { %v1362_v59 = vsel %vm5066_vm13, %v1353_v10, %v4262_v15  ;;  %v1361_v28 = vsel %vm5067_vm5, %v1352_v13, %v1191_v5  ;;  %vm5068_vm13 = vcmask 457728   ;;  %vm5071_vm7 = vmmov %vm5070_vm4 }
 0x1f0   : > { %v1371_v51 = vsel %vm1363_vm9, %v1362_v59, %v1225_v55  ;;  %vm5069_vm3 = vmmov %vm5068_vm13  ;;  %v1545_v55 = vld [vmem:[%s3767_s30 + $0x10] sm:$0xff] }
 0x1f1   : > { %v1223_v37 = vpop.permute.xlu0 %1222  ;;  %v1288_v22 = vpop.permute.xlu1 %1287  ;;  %v1380_v26 = vsel %vm1372_vm14, %v1371_v51, %v4189_v60  ;;  %v3169_v63 = vpack.c.bf16 %v1546_v20, %v1545_v55  ;;  %v2907_v60 = vld [vmem:[%s5074_s17] ss:$0 sm:$0xff]  ;;  %v1709_v55 = vld [vmem:[%s3786_s15 + $0x90] sm:$0xff]  ;;  %v1710_v20 = vld [vmem:[%s3786_s15 + $0x98] sm:$0xff] }
 0x1f2   : > { %v1370_v11 = vsel %vm1363_vm9, %v1361_v28, %v1223_v37  ;;  %v1389_v34 = vsel %vm5069_vm3, %v1380_v26, %v1288_v22  ;;  %vm5073_vm9 = vmmov %vm5072_vm10  ;;  %v1723_v51 = vld [vmem:[%s3786_s15 + $0x100] sm:$0xff]  ;;  %v1726_v26 = vld [vmem:[%s3786_s15 + $0x118] sm:$0xff] }
 0x1f3   : > { %3170 = vmatprep.subr.bf16.mxu0 %v3169_v63  ;;  %vm5077_vm3 = vmmov %vm5067_vm5 }
 0x1f4   : > { %3172 = vmatpush3.bf16.msra.mxu0 %v3169_v63 }
 0x1f5   : > { %v1255_v21 = vpop.permute.xlu0 %1254  ;;  %v1319_v9 = vpop.permute.xlu1 %1318 }
 0x1f6   : > { %v1379_v30 = vsel %vm1372_vm14, %v1370_v11, %v1255_v21  ;;  %v1398_v5 = vsel %vm5071_vm7, %v1389_v34, %v1319_v9  ;;  %vm5075_vm14 = vmmov %vm5067_vm5  ;;  %v1724_v11 = vld [vmem:[%s3786_s15 + $0x108] sm:$0xff]  ;;  %v1725_v21 = vld [vmem:[%s3786_s15 + $0x110] sm:$0xff] }
 0x1f7   : > { %v1388_v15 = vsel %vm5068_vm13, %v1379_v30, %v4260_v25  ;;  %vm5076_vm13 = vmmov %vm5067_vm5  ;;  %v3205_v30 = vpack.c.bf16 %v1724_v11, %v1723_v51  ;;  %v3209_v9 = vpack.c.bf16 %v1726_v26, %v1725_v21  ;;  %v1691_v34 = vld [vmem:[%s3786_s15] sm:$0xff]  ;;  %v1701_v51 = vld [vmem:[%s3786_s15 + $0x50] sm:$0xff] }
 0x1f8   : > { %vm5079_vm7 = vmmov %vm5077_vm3  ;;  %v1702_v11 = vld [vmem:[%s3786_s15 + $0x58] sm:$0xff] }
 0x1f9   : > { %v1317_v24 = vpop.permute.xlu0 %1316  ;;  %3206 = vmatprep.subr.bf16.mxu0 %v3205_v30  ;;  %v3195_v21 = vpack.c.bf16 %v1702_v11, %v1701_v51 }
 0x1fa   : > { %v1397_v47 = vsel %vm5070_vm4, %v1388_v15, %v1317_v24  ;;  %vm5078_vm4 = vmmov %vm5077_vm3  ;;  %v1707_v24 = vld [vmem:[%s3786_s15 + $0x80] sm:$0xff]  ;;  %v1708_v15 = vld [vmem:[%s3786_s15 + $0x88] sm:$0xff] }
 0x1fb   : > { %3102 = vmatprep.mubr.msk.f32.mxu0 %vm5072_vm10, %v1397_v47  ;;  %vm5080_vm10 = vmmov %vm5077_vm3  ;;  %v3173_v47 = vpack.c.bf16 %v1708_v15, %v1707_v24 }
 0x1fc   : > { %3103 = vmatmul.mubr.msk.f32.gmra.mrb[6].mxu0 %vm5073_vm9, %v1398_v5  ;;  %vm5081_vm9 = vmmov %vm5077_vm3  ;;  %v1692_v5 = vld [vmem:[%s3786_s15 + $0x8] sm:$0xff] }
 0x1fd   : > { %v3175_v63 = vpack.c.bf16 %v1692_v5, %v1691_v34  ;;  %3174 = vmatprep.subr.bf16.mxu1 %v3173_v47  ;;  %v1719_v34 = vld [vmem:[%s3786_s15 + $0xe0] sm:$0xff]  ;;  %v1720_v47 = vld [vmem:[%s3786_s15 + $0xe8] sm:$0xff] }
 0x1fe   : > { %v1703_v5 = vld [vmem:[%s3786_s15 + $0x60] sm:$0xff] }
 0x1ff   : > { %3176 = vmatpush3.bf16.msra.mxu1 %v3175_v63  ;;  %v1704_v63 = vld [vmem:[%s3786_s15 + $0x68] sm:$0xff] }
 0x28a   : > { %v3095_v25 = vpop.f32.mrb[0].mxu0 }
 0x28b   : > { %v1502_v42 = vadd.f32 %v3095_v25, %v2907_v60  ;;  %v1496_v62 = vpop.f32.mrb[1].mxu0  ;;  %v1693_v25 = vld [vmem:[%s3786_s15 + $0x10] sm:$0xff] }
 0x28c   : > { %v1497_v38 = vadd.f32 %v2907_v60, %v1496_v62  ;;  %v1711_v62 = vld [vmem:[%s3786_s15 + $0xa0] sm:$0xff] }
 0x28d   : > { %v1536_v54 = vmax.f32 %v1502_v42, 0.0  ;;  %v1694_v42 = vld [vmem:[%s3786_s15 + $0x18] sm:$0xff] }
 0x28e   : > { %v1535_v29 = vmax.f32 %v1497_v38, 0.0  ;;  %v1712_v38 = vld [vmem:[%s3786_s15 + $0xa8] sm:$0xff] }
 0x290   : > { %3113 = vmatprep.mubr.msk.f32.mxu0 %vm5075_vm14, %v1535_v29  ;;  %v3179_v29 = vpack.c.bf16 %v1694_v42, %v1693_v25  ;;  %v1722_v25 = vld [vmem:[%s3786_s15 + $0xf8] sm:$0xff]  ;;  %vm5082_vm14 = vcmask 1046528  }
 0x291   : > { %3114 = vmatmul.mubr.msk.f32.vlgmr.msra.gmra.mrb[8].mxu0 %vm5067_vm5, %v1536_v54  ;;  %v3181_v54 = vpack.c.bf16 %v1712_v38, %v1711_v62  ;;  %v3199_v62 = vpack.c.bf16 %v1704_v63, %v1703_v5  ;;  %vm5083_vm5 = vcmask 1040384  }
 0x292   : > { %3208 = vmatpush3.bf16.msra.mxu0 %v3205_v30  ;;  %v4381_v30 = vld [vmem:[%s545_s24] ss:$0 sm:$0xff]  ;;  %s3591_s24 = smov 96  }
 0x293   : > { %3210 = vmatprep.subr.bf16.mxu0 %v3209_v9 }
 0x296   : > { %3212 = vmatpush3.bf16.msra.mxu0 %v3209_v9 }
 0x2a0   : > { %v3098_v49 = vpop.f32.mrb[2].mxu0 }
 0x2a1   : > { %v1512_v7 = vadd.f32 %v3098_v49, %v2907_v60  ;;  %v1506_v33 = vpop.f32.mrb[3].mxu0  ;;  %v1695_v49 = vld [vmem:[%s3786_s15 + $0x20] sm:$0xff] }
 0x2a2   : > { %v1507_v16 = vadd.f32 %v2907_v60, %v1506_v33  ;;  %v1713_v33 = vld [vmem:[%s3786_s15 + $0xb0] sm:$0xff] }
 0x2a3   : > { %v1538_v46 = vmax.f32 %v1512_v7, 0.0  ;;  %v1696_v7 = vld [vmem:[%s3786_s15 + $0x28] sm:$0xff] }
 0x2a4   : > { %v1537_v3 = vmax.f32 %v1507_v16, 0.0  ;;  %v1714_v16 = vld [vmem:[%s3786_s15 + $0xb8] sm:$0xff] }
 0x2a6   : > { %3116 = vmatprep.mubr.msk.f32.mxu0 %vm5076_vm13, %v1537_v3  ;;  %v3183_v3 = vpack.c.bf16 %v1696_v7, %v1695_v49  ;;  %vm5084_vm13 = vmmov %vm5083_vm5 }
 0x2a7   : > { %3117 = vmatmul.mubr.msk.f32.gmra.mrb[10].mxu0 %vm5077_vm3, %v1538_v46  ;;  %v3185_v46 = vpack.c.bf16 %v1714_v16, %v1713_v33  ;;  %vm5085_vm3 = vnez %v5022_v17 }
 0x2bc   : > { %v3101_v56 = vpop.f32.mrb[4].mxu0 }
 0x2bd   : > { %v1522_v44 = vadd.f32 %v3101_v56, %v2907_v60  ;;  %v1516_v27 = vpop.f32.mrb[5].mxu0  ;;  %v1697_v56 = vld [vmem:[%s3786_s15 + $0x30] sm:$0xff] }
 0x2be   : > { %v1517_v39 = vadd.f32 %v2907_v60, %v1516_v27  ;;  %v1715_v27 = vld [vmem:[%s3786_s15 + $0xc0] sm:$0xff] }
 0x2bf   : > { %v1540_v10 = vmax.f32 %v1522_v44, 0.0  ;;  %v1698_v44 = vld [vmem:[%s3786_s15 + $0x38] sm:$0xff] }
 0x2c0   : > { %v1539_v23 = vmax.f32 %v1517_v39, 0.0  ;;  %v1716_v39 = vld [vmem:[%s3786_s15 + $0xc8] sm:$0xff] }
 0x2c2   : > { %3119 = vmatprep.mubr.msk.f32.mxu0 %vm5078_vm4, %v1539_v23  ;;  %v3187_v23 = vpack.c.bf16 %v1698_v44, %v1697_v56  ;;  %vm5087_vm4 = vnez %v5018_v58 }
 0x2c3   : > { %3120 = vmatmul.mubr.msk.f32.gmra.mrb[12].mxu0 %vm5079_vm7, %v1540_v10  ;;  %v3189_v10 = vpack.c.bf16 %v1716_v39, %v1715_v27  ;;  %vm5088_vm7 = vmmov %vm5082_vm14 }
 0x2cf   : > { %v3104_v12 = vpop.f32.mrb[6].mxu0 }
 0x2d0   : > { %v1532_v13 = vadd.f32 %v3104_v12, %v2907_v60  ;;  %v1526_v59 = vpop.f32.mrb[7].mxu0  ;;  %v1699_v12 = vld [vmem:[%s3786_s15 + $0x40] sm:$0xff] }
 0x2d1   : > { %v1527_v37 = vadd.f32 %v2907_v60, %v1526_v59  ;;  %v3177_v60 = vpack.c.bf16 %v1710_v20, %v1709_v55  ;;  %v1717_v59 = vld [vmem:[%s3786_s15 + $0xd0] sm:$0xff]  ;;  %v3197_v20 = vpack.c.bf16 %v1720_v47, %v1719_v34 }
 0x2d2   : > { %v1542_v28 = vmax.f32 %v1532_v13, 0.0  ;;  %v1700_v13 = vld [vmem:[%s3786_s15 + $0x48] sm:$0xff] }
 0x2d3   : > { %v1541_v22 = vmax.f32 %v1527_v37, 0.0  ;;  %3178 = vmatprep.subr.bf16.mxu1 %v3177_v60  ;;  %v1718_v37 = vld [vmem:[%s3786_s15 + $0xd8] sm:$0xff]  ;;  %v1721_v60 = vld [vmem:[%s3786_s15 + $0xf0] sm:$0xff] }
 0x2d4   : > { %3180 = vmatpush3.bf16.msra.mxu1 %v3179_v29  ;;  %v3201_v38 = vpack.c.bf16 %v1722_v25, %v1721_v60  ;;  %v1705_v29 = vld [vmem:[%s3786_s15 + $0x70] sm:$0xff] }
 0x2d5   : > { %3122 = vmatprep.mubr.msk.f32.mxu0 %vm5080_vm10, %v1541_v22  ;;  %3182 = vmatprep.subr.bf16.mxu1 %v3181_v54  ;;  %v3191_v22 = vpack.c.bf16 %v1700_v13, %v1699_v12  ;;  %v1706_v54 = vld [vmem:[%s3786_s15 + $0x78] sm:$0xff]  ;;  %vm5089_vm10 = vmmov %vm5088_vm7 }
 0x2d6   : > { %3123 = vmatmul.mubr.msk.f32.gmra.mrb[14].mxu0 %vm5081_vm9, %v1542_v28  ;;  %v3193_v28 = vpack.c.bf16 %v1718_v37, %v1717_v59  ;;  %vm5090_vm9 = vmmov %vm5083_vm5 }
 0x2d8   : > { %3184 = vmatpush3.bf16.msra.mxu1 %v3183_v3  ;;  %v3203_v3 = vpack.c.bf16 %v1706_v54, %v1705_v29 }
 0x2d9   : > { %3186 = vmatprep.subr.bf16.mxu1 %v3185_v46 }
 0x2dc   : > { %3188 = vmatpush3.bf16.msra.mxu1 %v3187_v23  ;;  %v5086_v23 = vmov 0.0  }
 0x2dd   : > { %3190 = vmatprep.subr.bf16.mxu1 %v3189_v10 }
 0x2e0   : > { %3192 = vmatpush3.bf16.msra.mxu1 %v3191_v22 }
 0x2e1   : > { %3194 = vmatprep.subr.bf16.mxu1 %v3193_v28 }
 0x2e4   : > { %3196 = vmatpush3.bf16.msra.mxu1 %v3195_v21 }
 0x2e5   : > { %3198 = vmatprep.subr.bf16.mxu1 %v3197_v20 }
 0x2e8   : > { %3200 = vmatpush3.bf16.msra.mxu1 %v3199_v62 }
 0x2e9   : > { %3202 = vmatprep.subr.bf16.mxu1 %v3201_v38 }
 0x2ec   : > { %3204 = vmatpush3.bf16.msra.mxu1 %v3203_v3 }
 0x364   : > { %v3115_v26 = vpop.f32.mrb[8].mxu0 }
 0x365   : > { %v1650_v9 = vadd.f32 %v3115_v26, %v4381_v30  ;;  %v1644_v24 = vpop.f32.mrb[9].mxu0 }
 0x366   : > { %v1645_v15 = vadd.f32 %v4381_v30, %v1644_v24 }
 0x367   : > { %v4388_v55 = vmax.f32 %v1650_v9, 0.0 }
 0x368   : > { %v4393_v42 = vmax.f32 %v1645_v15, 0.0 }
 0x369   : > { %v1772_v49 = vrot.slane %v4388_v55, 1  ;;  %v1736_v7 = vrot.slane %v4388_v55, 7 }
 0x36a   : > { %v1735_v33 = vrot.slane %v4393_v42, 7  ;;  %v1771_v16 = vrot.slane %v4393_v42, 1 }
 0x36c   : > { %v1773_v46 = vsel %vm5082_vm14, %v1771_v16, %v1772_v49  ;;  %v4403_v56 = vsel %vm5083_vm5, %v1735_v33, %v1736_v7  ;;  %v4406_v44 = vsel %vm5084_vm13, 0.0, %v1735_v33  ;;  %vm5091_vm14 = vmmov %vm5083_vm5  ;;  %vm5092_vm5 = vcmask 261120  }
 0x36d   : > { %v1816_v27 = vsel %vm3948_vm8, %v1773_v46, 0.0  ;;  %v1826_v39 = vsel %vm5085_vm3, %v4403_v56, 0.0  ;;  %v1806_v13 = vsel %vm5085_vm3, %v4406_v44, 0.0  ;;  %v1807_v26 = vsel %vm3915_vm6, %v4403_v56, 0.0  ;;  %vm5093_vm13 = vmmov %vm5092_vm5 }
 0x36e   : > { %v3300_v10 = vpack.i.bf16 %v5086_v23, %v1816_v27  ;;  %v3305_v12 = vpack.i.bf16 %v5086_v23, %v1826_v39  ;;  %v3310_v59 = vpack.i.bf16 %v1806_v13, %v4388_v55  ;;  %v1796_v47 = vsel %vm5087_vm4, %v1773_v46, 0.0 }
 0x36f   : > { %vm5094_vm3 = vnez %v5028_v53  ;;  %v1757_v6 = vsel %vm4023_vm11, %v4403_v56, 0.0 }
 0x370   : > { %3301 = vrot.lane.b32.xlu0 %v3300_v10, %s3586_s29  ;;  %3306 = vrot.lane.b32.xlu1 %v3305_v12, %s3590_s22 }
 0x374   : > { %3311 = vrot.lane.b32.xlu0 %v3310_v59, %s3591_s24 }
 0x37a   : > { %v3118_v37 = vpop.f32.mrb[10].mxu0 }
 0x37b   : > { %v1660_v22 = vadd.f32 %v3118_v37, %v4381_v30  ;;  %v1654_v28 = vpop.f32.mrb[11].mxu0 }
 0x37c   : > { %v1655_v51 = vadd.f32 %v4381_v30, %v1654_v28 }
 0x37d   : > { %v4424_v11 = vmax.f32 %v1660_v22, 0.0 }
 0x37e   : > { %v4426_v21 = vmax.f32 %v1655_v51, 0.0 }
 0x37f   : > { %v1776_v17 = vrot.slane %v4424_v11, 1  ;;  %v1740_v9 = vrot.slane %v4424_v11, 7 }
 0x380   : > { %v3315_v24 = vpack.i.bf16 %v1807_v26, %v4426_v21  ;;  %v1774_v15 = vrot.slane %v4426_v21, 1  ;;  %v1738_v34 = vrot.slane %v4426_v21, 7 }
 0x382   : > { %3316 = vrot.lane.b32.xlu1 %v3315_v24, %s3591_s24  ;;  %v1775_v5 = vsel %vm5088_vm7, %v1772_v49, %v1774_v15  ;;  %v1777_v20 = vsel %vm5089_vm10, %v1774_v15, %v1776_v17  ;;  %v4442_v63 = vsel %vm5090_vm9, %v1736_v7, %v1738_v34  ;;  %v4445_v60 = vsel %vm5091_vm14, %v1738_v34, %v1740_v9  ;;  %vm5098_vm10 = vmmov %vm5090_vm9 }
 0x383   : > { %v1841_v25 = vsel %vm3948_vm8, %v1775_v5, 0.0  ;;  %v1842_v62 = vsel %vm5087_vm4, %v1777_v20, 0.0  ;;  %v1827_v38 = vsel %vm3915_vm6, %v4442_v63, 0.0  ;;  %v1817_v29 = vsel %vm5087_vm4, %v1775_v5, 0.0  ;;  %vm5096_vm4 = vmmov %vm5088_vm7 }
 0x384   : > { %3133 = vmatprep.mubr.msk.f32.mxu0 %vm5092_vm5, %v1841_v25  ;;  %v3325_v54 = vpack.i.bf16 %v1796_v47, %v1827_v38  ;;  %v3320_v49 = vpack.i.bf16 %v4393_v42, %v1817_v29  ;;  %v1818_v18 = vsel %vm5094_vm3, %v1777_v20, 0.0  ;;  %v1797_v7 = vsel %vm5094_vm3, %v1775_v5, 0.0  ;;  %vm5097_vm7 = vmmov %vm5096_vm4 }
 0x385   : > { %3134 = vmatmul.mubr.msk.f32.vlgmr.msra.gmra.mrb[16].mxu0 %vm5093_vm13, %v1842_v62  ;;  %v1828_v33 = vsel %vm4023_vm11, %v4445_v60, 0.0  ;;  %v3330_v58 = vpack.i.bf16 %v4388_v55, %v1818_v18  ;;  %v1808_v3 = vsel %vm4023_vm11, %v4442_v63, 0.0  ;;  %v1809_v37 = vsel %vm4035_vm12, %v4445_v60, 0.0  ;;  %vm5099_vm14 = vmmov %vm5092_vm5 }
 0x386   : > { %3326 = vrot.lane.b32.xlu0 %v3325_v54, %s3590_s22  ;;  %3321 = vrot.lane.b32.xlu1 %v3320_v49, %s3586_s29  ;;  %v3335_v16 = vpack.i.bf16 %v1797_v7, %v1828_v33  ;;  %v3340_v46 = vpack.i.bf16 %v1808_v3, %v4424_v11  ;;  %vm5095_vm8 = vnez %v5026_v50  ;;  %vm5100_vm13 = vnez %v5034_v31 }
 0x387   : > { %v1798_v15 = vsel %vm5095_vm8, %v1777_v20, 0.0  ;;  %v1759_v4 = vsel %vm4103_vm15, %v4445_v60, 0.0 }
 0x38a   : > { %3331 = vrot.lane.b32.xlu0 %v3330_v58, %s3586_s29  ;;  %3336 = vrot.lane.b32.xlu1 %v3335_v16, %s3590_s22 }
 0x38e   : > { %3341 = vrot.lane.b32.xlu0 %v3340_v46, %s3591_s24 }
 0x396   : > { %v3121_v27 = vpop.f32.mrb[12].mxu0 }
 0x397   : > { %v1670_v39 = vadd.f32 %v3121_v27, %v4381_v30  ;;  %v1664_v10 = vpop.f32.mrb[13].mxu0 }
 0x398   : > { %v1665_v12 = vadd.f32 %v4381_v30, %v1664_v10 }
 0x399   : > { %v4478_v13 = vmax.f32 %v1670_v39, 0.0 }
 0x39a   : > { %v4480_v59 = vmax.f32 %v1665_v12, 0.0 }
 0x39b   : > { %v1780_v22 = vrot.slane %v4478_v13, 1  ;;  %v1744_v28 = vrot.slane %v4478_v13, 7 }
 0x39c   : > { %v3345_v51 = vpack.i.bf16 %v1809_v37, %v4480_v59  ;;  %v1778_v26 = vrot.slane %v4480_v59, 1  ;;  %v1742_v24 = vrot.slane %v4480_v59, 7 }
 0x39e   : > { %3346 = vrot.lane.b32.xlu1 %v3345_v51, %s3591_s24  ;;  %v1779_v34 = vsel %vm5096_vm4, %v1776_v17, %v1778_v26  ;;  %v1781_v47 = vsel %vm5097_vm7, %v1778_v26, %v1780_v22  ;;  %v4496_v5 = vsel %vm5098_vm10, %v1740_v9, %v1742_v24  ;;  %v4499_v25 = vsel %vm5090_vm9, %v1742_v24, %v1744_v28  ;;  %vm5103_vm7 = vmmov %vm5096_vm4 }
 0x39f   : > { %v1843_v62 = vsel %vm5094_vm3, %v1779_v34, 0.0  ;;  %v1844_v38 = vsel %vm5095_vm8, %v1781_v47, 0.0  ;;  %v1829_v20 = vsel %vm4035_vm12, %v4496_v5, 0.0  ;;  %v1819_v17 = vsel %vm5095_vm8, %v1779_v34, 0.0  ;;  %vm5102_vm8 = vmmov %vm5096_vm4 }
 0x3a0   : > { %3136 = vmatprep.mubr.msk.f32.mxu0 %vm5099_vm14, %v1843_v62  ;;  %v3355_v9 = vpack.i.bf16 %v1798_v15, %v1829_v20  ;;  %v3350_v29 = vpack.i.bf16 %v4426_v21, %v1819_v17  ;;  %v1820_v53 = vsel %vm5100_vm13, %v1781_v47, 0.0  ;;  %v1799_v54 = vsel %vm5100_vm13, %v1779_v34, 0.0  ;;  %vm5104_vm10 = vmmov %vm5090_vm9 }
 0x3a1   : > { %3137 = vmatmul.mubr.msk.f32.gmra.mrb[18].mxu0 %vm5092_vm5, %v1844_v38  ;;  %v1830_v49 = vsel %vm4103_vm15, %v4499_v25, 0.0  ;;  %v3360_v50 = vpack.i.bf16 %v4424_v11, %v1820_v53  ;;  %v1810_v7 = vsel %vm4103_vm15, %v4496_v5, 0.0  ;;  %v1811_v12 = vsel %vm4107_vm0, %v4499_v25, 0.0  ;;  %vm5105_vm9 = vmmov %vm5092_vm5 }
 0x3a2   : > { %3356 = vrot.lane.b32.xlu0 %v3355_v9, %s3590_s22  ;;  %3351 = vrot.lane.b32.xlu1 %v3350_v29, %s3586_s29  ;;  %v3365_v18 = vpack.i.bf16 %v1799_v54, %v1830_v49  ;;  %v3370_v33 = vpack.i.bf16 %v1810_v7, %v4478_v13  ;;  %vm5101_vm3 = vnez %v5036_v32  ;;  %vm5106_vm14 = vmmov %vm5092_vm5  ;;  %vm5107_vm5 = vnez %v5044_v2 }
 0x3a6   : > { %3361 = vrot.lane.b32.xlu0 %v3360_v50, %s3586_s29  ;;  %3366 = vrot.lane.b32.xlu1 %v3365_v18, %s3590_s22 }
 0x3a9   : > { %v3124_v58 = vpop.f32.mrb[14].mxu0 }
 0x3aa   : > { %v1680_v16 = vadd.f32 %v3124_v58, %v4381_v30  ;;  %v1674_v3 = vpop.f32.mrb[15].mxu0  ;;  %3371 = vrot.lane.b32.xlu0 %v3370_v33, %s3591_s24 }
 0x3ab   : > { %v1675_v46 = vadd.f32 %v4381_v30, %v1674_v3  ;;  %v1800_v30 = vsel %vm5101_vm3, %v1781_v47, 0.0 }
 0x3ac   : > { %v4532_v27 = vmax.f32 %v1680_v16, 0.0 }
 0x3ad   : > { %v4534_v39 = vmax.f32 %v1675_v46, 0.0 }
 0x3ae   : > { %v1784_v10 = vrot.slane %v4532_v27, 1  ;;  %v1803_v24 = vrot.slane %v4532_v27, 7 }
 0x3af   : > { %v3375_v37 = vpack.i.bf16 %v1811_v12, %v4534_v39  ;;  %v1782_v51 = vrot.slane %v4534_v39, 1  ;;  %v1746_v26 = vrot.slane %v4534_v39, 7 }
 0x3b0   : > { %v1815_v62 = vsel %vm5103_vm7, %v1784_v10, 0.0 }
 0x3b1   : > { %3376 = vrot.lane.b32.xlu1 %v3375_v37, %s3591_s24  ;;  %v1783_v15 = vsel %vm5102_vm8, %v1780_v22, %v1782_v51  ;;  %v1785_v34 = vsel %vm5096_vm4, %v1782_v51, %v1784_v10  ;;  %v4551_v38 = vsel %vm5104_vm10, %v1744_v28, %v1746_v26  ;;  %v1847_v31 = vsel %vm5107_vm5, %v1815_v62, 0.0  ;;  %vm5109_vm8 = vmmov %vm5105_vm9 }
 0x3b2   : > { %v1845_v20 = vsel %vm5100_vm13, %v1783_v15, 0.0  ;;  %v1846_v17 = vsel %vm5101_vm3, %v1785_v34, 0.0  ;;  %v1831_v47 = vsel %vm4107_vm0, %v4551_v38, 0.0  ;;  %v1821_v22 = vsel %vm5101_vm3, %v1783_v15, 0.0  ;;  %vm5108_vm13 = vmmov %vm5104_vm10 }
 0x3b3   : > { %3139 = vmatprep.mubr.msk.f32.mxu0 %vm5105_vm9, %v1845_v20  ;;  %v3385_v9 = vpack.i.bf16 %v1800_v30, %v1831_v47  ;;  %v3380_v29 = vpack.i.bf16 %v4480_v59, %v1821_v22  ;;  %v1822_v28 = vsel %vm5107_vm5, %v1785_v34, 0.0  ;;  %v1804_v53 = vsel %vm5108_vm13, %v1746_v26, %v1803_v24  ;;  %vm5112_vm7 = vmmov %vm5109_vm8 }
 0x3b4   : > { %3140 = vmatmul.mubr.msk.f32.gmra.mrb[20].mxu0 %vm5106_vm14, %v1846_v17  ;;  %v1801_v32 = vsel %vm5107_vm5, %v1783_v15, 0.0  ;;  %vm5110_vm3 = vnez %v5046_v14  ;;  %v3390_v49 = vpack.i.bf16 %v4478_v13, %v1822_v28  ;;  %vm5111_vm4 = vnez %v5042_v45  ;;  %vm5113_vm10 = vmmov %vm5112_vm7 }
 0x3b5   : > { %3142 = vmatprep.mubr.msk.f32.mxu0 %vm5109_vm8, %v1847_v31  ;;  %3386 = vrot.lane.b32.xlu0 %v3385_v9, %s3590_s22  ;;  %v1832_v54 = vsel %vm5110_vm3, %v1804_v53, 0.0  ;;  %v1812_v18 = vsel %vm5110_vm3, %v4551_v38, 0.0  ;;  %v1823_v2 = vsel %vm5111_vm4, %v1815_v62, 0.0  ;;  %v1802_v58 = vsel %vm5111_vm4, %v1785_v34, 0.0  ;;  %vm5116_vm13 = vmmov %vm5112_vm7 }
 0x3b6   : > { %3381 = vrot.lane.b32.xlu1 %v3380_v29, %s3586_s29  ;;  %v3395_v50 = vpack.i.bf16 %v1801_v32, %v1832_v54  ;;  %v3405_v7 = vpack.i.bf16 %v1812_v18, %v4532_v27  ;;  %v3400_v33 = vpack.i.bf16 %v4534_v39, %v1823_v2  ;;  %v1813_v16 = vsel %vm4177_vm2, %v1804_v53, 0.0  ;;  %vm5117_vm8 = vmmov %vm5112_vm7 }
 0x3b7   : > { %v3410_v3 = vpack.i.bf16 %v1802_v58, %v5086_v23  ;;  %v3415_v46 = vpack.i.bf16 %v1813_v16, %v5086_v23  ;;  %vm2054_vm9 = vcmask 785408   ;;  %vm5114_vm14 = vcmask 523264  }
 0x3b8   : > { %3143 = vmatmul.mubr.f32.gmra.mrb[22].mxu0 %v5086_v23  ;;  %vm5115_vm5 = vmmov %vm5114_vm14  ;;  %v1756_v32 = vsel %vm3915_vm6, %v4406_v44, 0.0 }
 0x3b9   : > { %3391 = vrot.lane.b32.xlu0 %v3390_v49, %s3586_s29  ;;  %vm5118_vm4 = vmmov %vm5115_vm5 }
 0x3ba   : > { %3396 = vrot.lane.b32.xlu1 %v3395_v50, %s3590_s22  ;;  %vm5120_vm6 = vmmov %vm5117_vm8 }
 0x3bb   : > { %vm5124_vm11 = vmmov %vm5120_vm6 }
 0x3bd   : > { %3406 = vrot.lane.b32.xlu0 %v3405_v7, %s3591_s24 }
 0x3be   : > { %3401 = vrot.lane.b32.xlu1 %v3400_v33, %s3586_s29 }
 0x3c1   : > { %3411 = vrot.lane.b32.xlu0 %v3410_v3, %s3590_s22 }
 0x3c2   : > { %3416 = vrot.lane.b32.xlu1 %v3415_v46, %s3591_s24 }
 0x3e2   : > { %v3302_v10 = vpop.permute.xlu0 %3301  ;;  %v3307_v12 = vpop.permute.xlu1 %3306 }
 0x3e3   : > { %v3304_v37 = vunpack.i.h.bf16 %v3302_v10  ;;  %v3303_v45 = vunpack.i.l.bf16 %v3302_v10  ;;  %v3309_v51 = vunpack.i.h.bf16 %v3307_v12  ;;  %v3308_v26 = vunpack.i.l.bf16 %v3307_v12 }
 0x3e5   : > { %v2038_v24 = vsel %vm5112_vm7, 0.0, %v3304_v37  ;;  %v2063_v30 = vsel %vm5113_vm10, %v4393_v42, %v3303_v45  ;;  %vm5119_vm7 = vmmov %vm5118_vm4 }
 0x3e6   : > { %v3312_v15 = vpop.permute.xlu0 %3311  ;;  %v2046_v23 = vsel %vm5114_vm14, %v2038_v24, %v3309_v51  ;;  %v2071_v20 = vsel %vm5115_vm5, %v2063_v30, %v3308_v26  ;;  %vm5121_vm10 = vmmov %vm5120_vm6 }
 0x3e7   : > { %v3314_v34 = vunpack.i.h.bf16 %v3312_v15  ;;  %v3313_v62 = vunpack.i.l.bf16 %v3312_v15  ;;  %vm5122_vm14 = vmmov %vm5118_vm4 }
 0x3e8   : > { %vm5123_vm5 = vmmov %vm5118_vm4 }
 0x3e9   : > { %v2079_v17 = vsel %vm2054_vm9, %v2071_v20, %v3313_v62  ;;  %v2055_v47 = vsel %vm2054_vm9, %v2046_v23, %v3314_v34 }
 0x3ea   : > { %2180 = vmatprep.mubr.f32.mxu1 %v2079_v17 }
 0x3eb   : > { %2181 = vmatmul.mubr.f32.vlgmr.msra.gmra.mrb[8].mxu1 %v2055_v47  ;;  %v1758_v47 = vsel %vm4035_vm12, %v4442_v63, 0.0  ;;  %vm5127_vm12 = vmmov %vm5120_vm6 }
 0x3f4   : > { %v3317_v22 = vpop.permute.xlu1 %3316 }
 0x3f5   : > { %v3319_v50 = vunpack.i.h.bf16 %v3317_v22  ;;  %v3318_v18 = vunpack.i.l.bf16 %v3317_v22 }
 0x3f8   : > { %v3327_v9 = vpop.permute.xlu0 %3326  ;;  %v3322_v29 = vpop.permute.xlu1 %3321 }
 0x3f9   : > { %v3329_v31 = vunpack.i.h.bf16 %v3327_v9  ;;  %v3328_v28 = vunpack.i.l.bf16 %v3327_v9  ;;  %v3324_v42 = vunpack.i.h.bf16 %v3322_v29  ;;  %v3323_v53 = vunpack.i.l.bf16 %v3322_v29 }
 0x3fb   : > { %v2064_v54 = vsel %vm5116_vm13, %v4388_v55, %v3323_v53  ;;  %v2039_v49 = vsel %vm5117_vm8, %v1756_v32, %v3324_v42  ;;  %vm5125_vm13 = vmmov %vm5120_vm6 }
 0x3fc   : > { %v3332_v2 = vpop.permute.xlu0 %3331  ;;  %v3337_v7 = vpop.permute.xlu1 %3336  ;;  %v2072_v33 = vsel %vm5118_vm4, %v2064_v54, %v3328_v28  ;;  %v2047_v58 = vsel %vm5119_vm7, %v2039_v49, %v3329_v31  ;;  %vm5126_vm8 = vmmov %vm5118_vm4 }
 0x3fd   : > { %v3334_v16 = vunpack.i.h.bf16 %v3332_v2  ;;  %v3333_v3 = vunpack.i.l.bf16 %v3332_v2  ;;  %v3339_v44 = vunpack.i.h.bf16 %v3337_v7  ;;  %v3338_v46 = vunpack.i.l.bf16 %v3337_v7  ;;  %vm5128_vm7 = vmmov %vm5120_vm6 }
 0x3fe   : > { %v2080_v55 = vsel %vm2054_vm9, %v2072_v33, %v3318_v18  ;;  %v2056_v10 = vsel %vm2054_vm9, %v2047_v58, %v3319_v50  ;;  %vm5131_vm15 = vmmov %vm5128_vm7 }
 0x3ff   : > { %2185 = vmatprep.mubr.f32.mxu1 %v2080_v55  ;;  %v2065_v12 = vsel %vm5120_vm6, %v4426_v21, %v3333_v3  ;;  %v2040_v37 = vsel %vm5121_vm10, %v1757_v6, %v3334_v16  ;;  %vm5129_vm6 = vmmov %vm5118_vm4 }
 0x400   : > { %2186 = vmatmul.mubr.f32.gmra.mrb[10].mxu1 %v2056_v10  ;;  %v3342_v45 = vpop.permute.xlu0 %3341  ;;  %v2073_v24 = vsel %vm5122_vm14, %v2065_v12, %v3338_v46  ;;  %v2048_v0 = vsel %vm5123_vm5, %v2040_v37, %v3339_v44  ;;  %vm5130_vm10 = vmmov %vm5118_vm4 }
 0x401   : > { %v3344_v51 = vunpack.i.h.bf16 %v3342_v45  ;;  %v3343_v26 = vunpack.i.l.bf16 %v3342_v45  ;;  %v1760_v45 = vsel %vm4107_vm0, %v4496_v5, 0.0  ;;  %vm5132_vm14 = vmmov %vm5128_vm7 }
 0x402   : > { %vm5133_vm5 = vmmov %vm5118_vm4 }
 0x403   : > { %v2081_v56 = vsel %vm2054_vm9, %v2073_v24, %v3343_v26  ;;  %v2057_v30 = vsel %vm2054_vm9, %v2048_v0, %v3344_v51  ;;  %v1761_v51 = vsel %vm5110_vm3, %v4499_v25, 0.0  ;;  %vm5135_vm0 = vmmov %vm5128_vm7 }
 0x404   : > { %2190 = vmatprep.mubr.f32.mxu1 %v2081_v56  ;;  %vm5136_vm3 = vmmov %vm5135_vm0 }
 0x405   : > { %2191 = vmatmul.mubr.f32.gmra.mrb[12].mxu1 %v2057_v30 }
 0x410   : > { %v3347_v15 = vpop.permute.xlu1 %3346 }
 0x411   : > { %v3349_v29 = vunpack.i.h.bf16 %v3347_v15  ;;  %v3348_v31 = vunpack.i.l.bf16 %v3347_v15 }
 0x414   : > { %v3357_v34 = vpop.permute.xlu0 %3356  ;;  %v3352_v62 = vpop.permute.xlu1 %3351 }
 0x415   : > { %v3359_v21 = vunpack.i.h.bf16 %v3357_v34  ;;  %v3358_v23 = vunpack.i.l.bf16 %v3357_v34  ;;  %v3354_v20 = vunpack.i.h.bf16 %v3352_v62  ;;  %v3353_v17 = vunpack.i.l.bf16 %v3352_v62 }
 0x417   : > { %v2066_v22 = vsel %vm5124_vm11, %v4424_v11, %v3353_v17  ;;  %v2041_v9 = vsel %vm5125_vm13, %v1758_v47, %v3354_v20  ;;  %vm5134_vm11 = vmmov %vm5118_vm4 }
 0x418   : > { %v3362_v28 = vpop.permute.xlu0 %3361  ;;  %v3367_v42 = vpop.permute.xlu1 %3366  ;;  %v2074_v53 = vsel %vm5126_vm8, %v2066_v22, %v3358_v23  ;;  %v2049_v32 = vsel %vm5118_vm4, %v2041_v9, %v3359_v21  ;;  %vm5137_vm13 = vmmov %vm5118_vm4 }
 0x419   : > { %v3364_v54 = vunpack.i.h.bf16 %v3362_v28  ;;  %v3363_v49 = vunpack.i.l.bf16 %v3362_v28  ;;  %v3369_v63 = vunpack.i.h.bf16 %v3367_v42  ;;  %v3368_v50 = vunpack.i.l.bf16 %v3367_v42  ;;  %vm5138_vm8 = vmmov %vm5118_vm4 }
 0x41a   : > { %v2082_v11 = vsel %vm2054_vm9, %v2074_v53, %v3348_v31  ;;  %v2058_v18 = vsel %vm2054_vm9, %v2049_v32, %v3349_v29  ;;  %vm5139_vm4 = vmmov %vm5135_vm0 }
 0x41b   : > { %2195 = vmatprep.mubr.f32.mxu1 %v2082_v11  ;;  %v2067_v2 = vsel %vm5127_vm12, %v4480_v59, %v3363_v49  ;;  %v2042_v7 = vsel %vm5128_vm7, %v1759_v4, %v3364_v54  ;;  %vm5140_vm12 = vmmov %vm5135_vm0 }
 0x41c   : > { %2196 = vmatmul.mubr.f32.gmra.mrb[14].mxu1 %v2058_v18  ;;  %v3372_v33 = vpop.permute.xlu0 %3371  ;;  %v2075_v3 = vsel %vm5129_vm6, %v2067_v2, %v3368_v50  ;;  %v2050_v35 = vsel %vm5130_vm10, %v2042_v7, %v3369_v63  ;;  %v1762_v63 = vsel %vm4177_vm2, %v4551_v38, 0.0  ;;  %vm5141_vm7 = vmmov %vm5133_vm5  ;;  %vm5143_vm2 = vcmask 130048  }
 0x41d   : > { %v3374_v58 = vunpack.i.h.bf16 %v3372_v33  ;;  %v3373_v16 = vunpack.i.l.bf16 %v3372_v33  ;;  %vm5142_vm6 = vmmov %vm5133_vm5 }
 0x41e   : > { %vm5145_vm10 = vmmov %vm5143_vm2 }
 0x41f   : > { %v2083_v60 = vsel %vm2054_vm9, %v2075_v3, %v3373_v16  ;;  %v2059_v6 = vsel %vm2054_vm9, %v2050_v35, %v3374_v58 }
 0x420   : > { %2200 = vmatprep.mubr.f32.mxu1 %v2083_v60 }
 0x421   : > { %2201 = vmatmul.mubr.f32.gmra.mrb[16].mxu1 %v2059_v6 }
 0x423   : > { %v3377_v44 = vpop.permute.xlu1 %3376 }
 0x424   : > { %v3379_v26 = vunpack.i.h.bf16 %v3377_v44  ;;  %v3378_v24 = vunpack.i.l.bf16 %v3377_v44 }
 0x427   : > { %v3387_v46 = vpop.permute.xlu0 %3386 }
 0x428   : > { %v3389_v55 = vunpack.i.h.bf16 %v3387_v46  ;;  %v3388_v59 = vunpack.i.l.bf16 %v3387_v46  ;;  %v3382_v10 = vpop.permute.xlu1 %3381 }
 0x429   : > { %v3384_v12 = vunpack.i.h.bf16 %v3382_v10  ;;  %v3383_v37 = vunpack.i.l.bf16 %v3382_v10 }
 0x42b   : > { %v3392_v0 = vpop.permute.xlu0 %3391  ;;  %v2068_v56 = vsel %vm5131_vm15, %v4478_v13, %v3383_v37  ;;  %v2043_v30 = vsel %vm5132_vm14, %v1760_v45, %v3384_v12  ;;  %vm5146_vm15 = vmmov %vm5143_vm2 }
 0x42c   : > { %v3394_v15 = vunpack.i.h.bf16 %v3392_v0  ;;  %v3393_v34 = vunpack.i.l.bf16 %v3392_v0  ;;  %v3397_v62 = vpop.permute.xlu1 %3396  ;;  %v2076_v21 = vsel %vm5133_vm5, %v2068_v56, %v3388_v59  ;;  %v2051_v36 = vsel %vm5134_vm11, %v2043_v30, %v3389_v55  ;;  %v4688_v55 = vld [vmem:[%s553_s20] ss:$0 sm:$0xff]  ;;  %vm5147_vm14 = vmmov %vm5143_vm2  ;;  %s5151_s20 = sld [smem:[#allocation9_spill]] }
 0x42d   : > { %v3399_v5 = vunpack.i.h.bf16 %v3397_v62  ;;  %v3398_v23 = vunpack.i.l.bf16 %v3397_v62  ;;  %v2084_v14 = vsel %vm2054_vm9, %v2076_v21, %v3378_v24  ;;  %v2060_v25 = vsel %vm2054_vm9, %v2051_v36, %v3379_v26  ;;  %vm5148_vm5 = vmmov %vm5143_vm2 }
 0x42e   : > { %2205 = vmatprep.mubr.f32.mxu1 %v2084_v14  ;;  %v2069_v20 = vsel %vm5135_vm0, %v4534_v39, %v3393_v34  ;;  %v2044_v13 = vsel %vm5136_vm3, %v1761_v51, %v3394_v15  ;;  %vm5149_vm11 = vmmov %vm5143_vm2  ;;  %vm2605_vm3 = vcmask 0  }
 0x42f   : > { %2206 = vmatmul.mubr.f32.gmra.mrb[18].mxu1 %v2060_v25  ;;  %v3407_v17 = vpop.permute.xlu0 %3406  ;;  %v2077_v28 = vsel %vm5137_vm13, %v2069_v20, %v3398_v23  ;;  %v2052_v42 = vsel %vm5138_vm8, %v2044_v13, %v3399_v5  ;;  %vm5150_vm0 = vmmov %vm5143_vm2 }
 0x430   : > { %v3409_v47 = vunpack.i.h.bf16 %v3407_v17  ;;  %v3408_v22 = vunpack.i.l.bf16 %v3407_v17  ;;  %v3402_v9 = vpop.permute.xlu1 %3401 }
 0x431   : > { %v3404_v29 = vunpack.i.h.bf16 %v3402_v9  ;;  %v3403_v31 = vunpack.i.l.bf16 %v3402_v9 }
 0x432   : > { %v2085_v53 = vsel %vm2054_vm9, %v2077_v28, %v3408_v22  ;;  %v2061_v32 = vsel %vm2054_vm9, %v2052_v42, %v3409_v47  ;;  %p2941_p1 = scmp.ne.s32.totalorder %s5151_s20, 1 }
 0x433   : > { %v3412_v54 = vpop.permute.xlu0 %3411  ;;  %2210 = vmatprep.mubr.f32.mxu1 %v2085_v53  ;;  %v2070_v18 = vsel %vm5139_vm4, %v4532_v27, %v3403_v31  ;;  %v2045_v2 = vsel %vm5140_vm12, %v1762_v63, %v3404_v29 }
 0x434   : > { %v3414_v39 = vunpack.i.h.bf16 %v3412_v54  ;;  %v3413_v49 = vunpack.i.l.bf16 %v3412_v54  ;;  %v3417_v4 = vpop.permute.xlu1 %3416  ;;  %2211 = vmatmul.mubr.f32.gmra.mrb[20].mxu1 %v2061_v32 }
 0x435   : > { %v3419_v50 = vunpack.i.h.bf16 %v3417_v4  ;;  %v3418_v11 = vunpack.i.l.bf16 %v3417_v4 }
 0x436   : > { %v2078_v7 = vsel %vm5141_vm7, %v2070_v18, %v3413_v49  ;;  %v2053_v33 = vsel %vm5142_vm6, %v2045_v2, %v3414_v39 }
 0x437   : > { %v2086_v58 = vsel %vm2054_vm9, %v2078_v7, %v3418_v11  ;;  %v2062_v16 = vsel %vm2054_vm9, %v2053_v33, %v3419_v50  ;;  %vm5144_vm9 = vmmov %vm5143_vm2 }
 0x438   : > { %2215 = vmatprep.mubr.f32.mxu1 %v2086_v58 }
 0x439   : > { %2216 = vmatmul.mubr.f32.gmra.mrb[22].mxu1 %v2062_v16 }
 0x458   : > { %v3135_v19 = vpop.f32.mrb[16].mxu0 }
 0x459   : > { %v2287_v38 = vpop.f32.mrb[17].mxu0 }
 0x474   : > { %v3138_v3 = vpop.f32.mrb[18].mxu0 }
 0x475   : > { %v2297_v35 = vpop.f32.mrb[19].mxu0 }
 0x487   : > { %v4675_v60 = vpop.f32.mrb[20].mxu0 }
 0x488   : > { %v4677_v27 = vpop.f32.mrb[21].mxu0 }
 0x48b   : > { %v4679_v6 = vpop.f32.mrb[22].mxu0 }
 0x48c   : > { %v4681_v44 = vpop.f32.mrb[23].mxu0 }
 0x4be   : > { %v3023_v46 = vpop.f32.mrb[8].mxu1 }
 0x4bf   : > { %v3024_v59 = vpop.f32.mrb[9].mxu1 }
 0x4c0   : > { %v3025_v10 = vadd.f32 %v3024_v59, %v3023_v46 }
 0x4c2   : > { %v2183_v12 = vadd.f32 %v3025_v10, %v4688_v55 }
 0x4c4   : > { %v4691_v37 = vadd.f32 %v2287_v38, %v2183_v12 }
 0x4c6   : > { %v4694_v45 = vadd.f32 2.0, %v4691_v37 }
 0x4c8   : > { %v2398_v51 = vand.u32 2147483647, %v4694_v45  ;;  %v2382_v29 = vsub.f32 0.0, %v4694_v45 }
 0x4ca   : > { %v2406_v26 = vsub.f32 0.0, %v2398_v51  ;;  %v2390_v53 = vmax.f32 %v2382_v29, 0.0 }
 0x4cc   : > { %v2414_v24 = vmul.f32 1.442695, %v2406_v26 }
 0x4ce   : > { %3420 = vpow2.f32 %v2414_v24 }
 0x4d3   : > { %v3026_v0 = vpop.f32.mrb[10].mxu1 }
 0x4d4   : > { %v3027_v56 = vpop.f32.mrb[11].mxu1 }
 0x4d5   : > { %v3028_v30 = vadd.f32 %v3027_v56, %v3026_v0 }
 0x4d7   : > { %v2188_v15 = vadd.f32 %v3028_v30, %v4688_v55 }
 0x4d8   : > { %v3421_v34 = vpop.eup %3420  ;;  %v3029_v62 = vpop.f32.mrb[12].mxu1 }
 0x4d9   : > { %v4698_v21 = vadd.f32 %v3135_v19, %v2188_v15  ;;  %v3030_v36 = vpop.f32.mrb[13].mxu1  ;;  %v2430_v5 = vadd.f32 1.0, %v3421_v34 }
 0x4da   : > { %v3031_v23 = vadd.f32 %v3030_v36, %v3029_v62 }
 0x4db   : > { %v4701_v14 = vadd.f32 2.0, %v4698_v21  ;;  %3422 = vlog2.f32 %v2430_v5 }
 0x4dc   : > { %v2193_v25 = vadd.f32 %v3031_v23, %v4688_v55 }
 0x4dd   : > { %v2399_v20 = vand.u32 2147483647, %v4701_v14 }
 0x4de   : > { %v4705_v13 = vadd.f32 %v2297_v35, %v2193_v25  ;;  %v2383_v35 = vsub.f32 0.0, %v4701_v14 }
 0x4df   : > { %v2407_v17 = vsub.f32 0.0, %v2399_v20 }
 0x4e0   : > { %v4708_v47 = vadd.f32 2.0, %v4705_v13  ;;  %v2391_v26 = vmax.f32 %v2383_v35, 0.0 }
 0x4e1   : > { %v2416_v22 = vmul.f32 1.442695, %v2407_v17 }
 0x4e2   : > { %v2400_v9 = vand.u32 2147483647, %v4708_v47  ;;  %v2384_v0 = vsub.f32 0.0, %v4708_v47 }
 0x4e3   : > { %3424 = vpow2.f32 %v2416_v22 }
 0x4e4   : > { %v2408_v31 = vsub.f32 0.0, %v2400_v9  ;;  %v2392_v5 = vmax.f32 %v2384_v0, 0.0 }
 0x4e5   : > { %v3423_v28 = vpop.eup %3422 }
 0x4e6   : > { %v2418_v42 = vmul.f32 1.442695, %v2408_v31  ;;  %v2439_v32 = vmul.f32 0.6931472, %v3423_v28 }
 0x4e8   : > { %v2454_v54 = vadd.f32 %v2439_v32, %v2390_v53  ;;  %3426 = vpow2.f32 %v2418_v42 }
 0x4ea   : > { %v2462_v39 = vsub.f32 0.0, %v2454_v54 }
 0x4ec   : > { %2542 = vrot.lane.b32.xlu0 %v2462_v39, %s3592_s26 }
 0x4ed   : > { %v3425_v49 = vpop.eup %3424 }
 0x4ee   : > { %v2431_v4 = vadd.f32 1.0, %v3425_v49 }
 0x4ef   : > { %v3032_v63 = vpop.f32.mrb[14].mxu1 }
 0x4f0   : > { %v3033_v50 = vpop.f32.mrb[15].mxu1  ;;  %3428 = vlog2.f32 %v2431_v4 }
 0x4f1   : > { %v3034_v11 = vadd.f32 %v3033_v50, %v3032_v63 }
 0x4f2   : > { %v3427_v18 = vpop.eup %3426 }
 0x4f3   : > { %v2198_v2 = vadd.f32 %v3034_v11, %v4688_v55  ;;  %v2432_v7 = vadd.f32 1.0, %v3427_v18 }
 0x4f4   : > { %v3035_v33 = vpop.f32.mrb[16].mxu1 }
 0x4f5   : > { %v4714_v58 = vadd.f32 %v3138_v3, %v2198_v2  ;;  %v3036_v16 = vpop.f32.mrb[17].mxu1  ;;  %3430 = vlog2.f32 %v2432_v7 }
 0x4f6   : > { %v3037_v19 = vadd.f32 %v3036_v16, %v3035_v33 }
 0x4f7   : > { %v4717_v38 = vadd.f32 2.0, %v4714_v58 }
 0x4f8   : > { %v2203_v46 = vadd.f32 %v3037_v19, %v4688_v55 }
 0x4f9   : > { %v2401_v59 = vand.u32 2147483647, %v4717_v38 }
 0x4fa   : > { %v3429_v10 = vpop.eup %3428  ;;  %v4723_v12 = vadd.f32 %v4677_v27, %v2203_v46 }
 0x4fb   : > { %v2409_v51 = vsub.f32 0.0, %v2401_v59  ;;  %v2441_v3 = vmul.f32 0.6931472, %v3429_v10  ;;  %v2385_v59 = vsub.f32 0.0, %v4717_v38 }
 0x4fc   : > { %v4726_v24 = vadd.f32 2.0, %v4723_v12 }
 0x4fd   : > { %v2420_v56 = vmul.f32 1.442695, %v2409_v51  ;;  %v2455_v30 = vadd.f32 %v2441_v3, %v2391_v26  ;;  %v2393_v0 = vmax.f32 %v2385_v59, 0.0 }
 0x4fe   : > { %v2402_v15 = vand.u32 2147483647, %v4726_v24 }
 0x4ff   : > { %v3431_v34 = vpop.eup %3430  ;;  %v2463_v62 = vsub.f32 0.0, %v2455_v30  ;;  %3432 = vpow2.f32 %v2420_v56  ;;  %v2386_v30 = vsub.f32 0.0, %v4726_v24 }
 0x500   : > { %v2410_v36 = vsub.f32 0.0, %v2402_v15  ;;  %v2443_v23 = vmul.f32 0.6931472, %v3431_v34 }
 0x501   : > { %2544 = vrot.lane.b32.xlu1 %v2463_v62, %s3592_s26 }
 0x502   : > { %v2422_v27 = vmul.f32 1.442695, %v2410_v36  ;;  %v3038_v25 = vpop.f32.mrb[18].mxu1  ;;  %v2456_v20 = vadd.f32 %v2443_v23, %v2392_v5  ;;  %v2394_v5 = vmax.f32 %v2386_v30, 0.0 }
 0x503   : > { %v3039_v17 = vpop.f32.mrb[19].mxu1 }
 0x504   : > { %v3040_v22 = vadd.f32 %v3039_v17, %v3038_v25  ;;  %v2464_v9 = vsub.f32 0.0, %v2456_v20  ;;  %3434 = vpow2.f32 %v2422_v27 }
 0x506   : > { %v2208_v29 = vadd.f32 %v3040_v22, %v4688_v55  ;;  %2546 = vrot.lane.b32.xlu0 %v2464_v9, %s3592_s26 }
 0x507   : > { %v3041_v31 = vpop.f32.mrb[20].mxu1 }
 0x508   : > { %v4734_v28 = vadd.f32 %v4675_v60, %v2208_v29  ;;  %v3042_v42 = vpop.f32.mrb[21].mxu1 }
 0x509   : > { %v3433_v53 = vpop.eup %3432  ;;  %v3043_v32 = vadd.f32 %v3042_v42, %v3041_v31 }
 0x50a   : > { %v4737_v54 = vadd.f32 2.0, %v4734_v28  ;;  %v2433_v39 = vadd.f32 1.0, %v3433_v53 }
 0x50b   : > { %v2213_v49 = vadd.f32 %v3043_v32, %v4688_v55 }
 0x50c   : > { %v2403_v4 = vand.u32 2147483647, %v4737_v54  ;;  %v3044_v63 = vpop.f32.mrb[22].mxu1  ;;  %3436 = vlog2.f32 %v2433_v39  ;;  %v2387_v29 = vsub.f32 0.0, %v4737_v54 }
 0x50d   : > { %v4742_v50 = vadd.f32 %v4681_v44, %v2213_v49  ;;  %v3045_v11 = vpop.f32.mrb[23].mxu1 }
 0x50e   : > { %v3435_v18 = vpop.eup %3434  ;;  %v2411_v60 = vsub.f32 0.0, %v2403_v4  ;;  %v3046_v2 = vadd.f32 %v3045_v11, %v3044_v63  ;;  %v2395_v53 = vmax.f32 %v2387_v29, 0.0 }
 0x50f   : > { %v4745_v7 = vadd.f32 2.0, %v4742_v50  ;;  %v2434_v33 = vadd.f32 1.0, %v3435_v18 }
 0x510   : > { %v2424_v16 = vmul.f32 1.442695, %v2411_v60  ;;  %v2218_v19 = vadd.f32 %v3046_v2, %v4688_v55 }
 0x511   : > { %v2404_v35 = vand.u32 2147483647, %v4745_v7  ;;  %3438 = vlog2.f32 %v2434_v33  ;;  %v2388_v39 = vsub.f32 0.0, %v4745_v7 }
 0x512   : > { %v4750_v46 = vadd.f32 %v4679_v6, %v2218_v19  ;;  %3440 = vpow2.f32 %v2424_v16 }
 0x513   : > { %v2412_v44 = vsub.f32 0.0, %v2404_v35  ;;  %v2396_v11 = vmax.f32 %v2388_v39, 0.0 }
 0x514   : > { %v4754_v10 = vadd.f32 2.0, %v4750_v46 }
 0x515   : > { %v2426_v51 = vmul.f32 1.442695, %v2412_v44 }
 0x516   : > { %v3437_v26 = vpop.eup %3436  ;;  %v2405_v3 = vand.u32 2147483647, %v4754_v10  ;;  %v2389_v60 = vsub.f32 0.0, %v4754_v10 }
 0x517   : > { %3442 = vpow2.f32 %v2426_v51  ;;  %v2445_v55 = vmul.f32 0.6931472, %v3437_v26 }
 0x518   : > { %v2413_v56 = vsub.f32 0.0, %v2405_v3  ;;  %v2397_v19 = vmax.f32 %v2389_v60, 0.0 }
 0x519   : > { %v2457_v15 = vadd.f32 %v2445_v55, %v2393_v0  ;;  %v2933_v55 = vmul.f32 -1.442695, %v4694_v45 }
 0x51a   : > { %v2428_v6 = vmul.f32 1.442695, %v2413_v56 }
 0x51b   : > { %v3439_v34 = vpop.eup %3438  ;;  %v2465_v62 = vsub.f32 0.0, %v2457_v15  ;;  %v2935_v15 = vmul.f32 -1.442695, %v4708_v47 }
 0x51c   : > { %v3441_v36 = vpop.eup %3440  ;;  %v2447_v23 = vmul.f32 0.6931472, %v3439_v34  ;;  %3444 = vpow2.f32 %v2428_v6 }
 0x51d   : > { %2548 = vrot.lane.b32.xlu1 %v2465_v62, %s3592_s26  ;;  %v2435_v27 = vadd.f32 1.0, %v3441_v36  ;;  %v2938_v62 = vmul.f32 -1.442695, %v4737_v54 }
 0x51e   : > { %v2458_v25 = vadd.f32 %v2447_v23, %v2394_v5 }
 0x51f   : > { %3446 = vlog2.f32 %v2435_v27 }
 0x520   : > { %v2466_v20 = vsub.f32 0.0, %v2458_v25 }
 0x521   : > { %v3443_v17 = vpop.eup %3442 }
 0x522   : > { %2550 = vrot.lane.b32.xlu0 %v2466_v20, %s3592_s26  ;;  %v2436_v22 = vadd.f32 1.0, %v3443_v17 }
 0x524   : > { %3448 = vlog2.f32 %v2436_v22 }
 0x526   : > { %v3445_v9 = vpop.eup %3444 }
 0x527   : > { %v2437_v31 = vadd.f32 1.0, %v3445_v9 }
 0x529   : > { %v3447_v42 = vpop.eup %3446  ;;  %3450 = vlog2.f32 %v2437_v31 }
 0x52a   : > { %v2449_v32 = vmul.f32 0.6931472, %v3447_v42 }
 0x52c   : > { %v2459_v49 = vadd.f32 %v2449_v32, %v2395_v53 }
 0x52e   : > { %v3449_v4 = vpop.eup %3448  ;;  %v2467_v63 = vsub.f32 0.0, %v2459_v49 }
 0x52f   : > { %v2451_v18 = vmul.f32 0.6931472, %v3449_v4 }
 0x530   : > { %2552 = vrot.lane.b32.xlu1 %v2467_v63, %s3592_s26 }
 0x531   : > { %v2460_v2 = vadd.f32 %v2451_v18, %v2396_v11 }
 0x533   : > { %v3451_v33 = vpop.eup %3450  ;;  %v2468_v16 = vsub.f32 0.0, %v2460_v2 }
 0x534   : > { %v2453_v35 = vmul.f32 0.6931472, %v3451_v33 }
 0x535   : > { %2554 = vrot.lane.b32.xlu0 %v2468_v16, %s3592_s26 }
 0x536   : > { %v2461_v44 = vadd.f32 %v2453_v35, %v2397_v19 }
 0x538   : > { %v2469_v59 = vsub.f32 0.0, %v2461_v44 }
 0x539   : > { %2480 = vrot.lane.b32.xlu0 %v4698_v21, %s3584_s18 }
 0x53a   : > { %2556 = vrot.lane.b32.xlu1 %v2469_v59, %s3592_s26 }
 0x53d   : > { %2486 = vrot.lane.b32.xlu0 %v4723_v12, %s3584_s18 }
 0x53e   : > { %2478 = vrot.lane.b32.xlu1 %v4691_v37, %s3584_s18 }
 0x542   : > { %2482 = vrot.lane.b32.xlu1 %v4705_v13, %s3584_s18  ;;  %v2934_v13 = vmul.f32 -1.442695, %v4701_v14  ;;  %v2936_v14 = vmul.f32 -1.442695, %v4717_v38 }
 0x544   : > { %3452 = vpow2.f32 %v2934_v13 }
 0x546   : > { %2484 = vrot.lane.b32.xlu1 %v4714_v58, %s3584_s18 }
 0x54a   : > { %2488 = vrot.lane.b32.xlu1 %v4734_v28, %s3584_s18  ;;  %v2937_v28 = vmul.f32 -1.442695, %v4726_v24 }
 0x54c   : > { %3454 = vpow2.f32 %v2937_v28 }
 0x54d   : > { %3456 = vpow2.f32 %v2933_v55 }
 0x54e   : > { %v3453_v6 = vpop.eup %3452  ;;  %3458 = vpow2.f32 %v2935_v15 }
 0x54f   : > { %v2359_v34 = vadd.f32 1.0, %v3453_v6  ;;  %3460 = vpow2.f32 %v2936_v14 }
 0x551   : > { %3462 = vrcp.f32 %v2359_v34 }
 0x552   : > { %3464 = vpow2.f32 %v2938_v62 }
 0x556   : > { %v3455_v36 = vpop.eup %3454 }
 0x557   : > { %v3457_v24 = vpop.eup %3456  ;;  %v2362_v23 = vadd.f32 1.0, %v3455_v36 }
 0x558   : > { %v2358_v27 = vadd.f32 1.0, %v3457_v24  ;;  %v3459_v25 = vpop.eup %3458 }
 0x559   : > { %3466 = vrcp.f32 %v2362_v23  ;;  %v2360_v38 = vadd.f32 1.0, %v3459_v25  ;;  %v3461_v17 = vpop.eup %3460 }
 0x55a   : > { %3468 = vrcp.f32 %v2358_v27  ;;  %v2361_v31 = vadd.f32 1.0, %v3461_v17 }
 0x55b   : > { %v3463_v22 = vpop.eup %3462  ;;  %3470 = vrcp.f32 %v2360_v38 }
 0x55c   : > { %v3465_v42 = vpop.eup %3464  ;;  %3472 = vrcp.f32 %v2361_v31 }
 0x55d   : > { %v2363_v11 = vadd.f32 1.0, %v3465_v42 }
 0x55e   : > { %v2543_v51 = vpop.permute.xlu0 %2542 }
 0x55f   : > { %v2566_v21 = vsel %vm1328_vm1, %v2543_v51, 0.0  ;;  %3474 = vrcp.f32 %v2363_v11 }
 0x560   : > { %2567 = vadd.xlane.f32.xlu0 %v2566_v21 }
 0x563   : > { %v3467_v18 = vpop.eup %3466 }
 0x564   : > { %v3469_v2 = vpop.eup %3468 }
 0x565   : > { %v3471_v59 = vpop.eup %3470 }
 0x573   : > { %v2545_v26 = vpop.permute.xlu1 %2544 }
 0x574   : > { %v2569_v3 = vsel %vm1328_vm1, %v2545_v26, 0.0 }
 0x575   : > { %2570 = vadd.xlane.f32.xlu1 %v2569_v3  ;;  %v3473_v3 = vpop.eup %3472 }
 0x578   : > { %v2547_v12 = vpop.permute.xlu0 %2546 }
 0x579   : > { %v2572_v37 = vsel %vm1328_vm1, %v2547_v12, 0.0 }
 0x57a   : > { %2573 = vadd.xlane.f32.xlu0 %v2572_v37 }
 0x58f   : > { %v2549_v0 = vpop.permute.xlu1 %2548 }
 0x590   : > { %v2575_v58 = vsel %vm1328_vm1, %v2549_v0, 0.0  ;;  %v3475_v0 = vpop.eup %3474 }
 0x591   : > { %2576 = vadd.xlane.f32.xlu0 %v2575_v58 }
 0x594   : > { %v2551_v56 = vpop.permute.xlu0 %2550 }
 0x595   : > { %v2578_v30 = vsel %vm1328_vm1, %v2551_v56, 0.0 }
 0x596   : > { %2579 = vadd.xlane.f32.xlu1 %v2578_v30 }
 0x5a2   : > { %v2553_v5 = vpop.permute.xlu1 %2552 }
 0x5a3   : > { %v2581_v45 = vsel %vm1328_vm1, %v2553_v5, 0.0 }
 0x5a4   : > { %2582 = vadd.xlane.f32.xlu0 %v2581_v45 }
 0x5a7   : > { %v2555_v47 = vpop.permute.xlu0 %2554 }
 0x5a8   : > { %v2584_v20 = vsel %vm1328_vm1, %v2555_v47, 0.0 }
 0x5a9   : > { %2585 = vadd.xlane.f32.xlu1 %v2584_v20 }
 0x5ab   : > { %v2481_v54 = vpop.permute.xlu0 %2480 }
 0x5ac   : > { %v2503_v9 = vadd.f32 %v3851_v41, %v2481_v54  ;;  %v2557_v29 = vpop.permute.xlu1 %2556 }
 0x5ad   : > { %v2587_v53 = vsel %vm1328_vm1, %v2557_v29, 0.0 }
 0x5ae   : > { %v2511_v32 = vmul.f32 %v3463_v22, %v2503_v9  ;;  %2588 = vadd.xlane.f32.xlu0 %v2587_v53 }
 0x5af   : > { %v2487_v39 = vpop.permute.xlu0 %2486 }
 0x5b0   : > { %v4795_v49 = vsel %vm1328_vm1, %v3851_v41, %v2511_v32  ;;  %v2506_v4 = vadd.f32 %v2487_v39, %v3896_v61  ;;  %v2479_v63 = vpop.permute.xlu1 %2478 }
 0x5b1   : > { %2527 = vst.msk [vmem:[%s3788_s28 + $0x8] sm:$0xff] %vm5143_vm2, %v4795_v49  ;;  %v2502_v60 = vadd.f32 %v2479_v63, %v3858_v43  ;;  %v2603_v63 = vld [vmem:[#allocation2] sm:$0x1] }
 0x5b2   : > { %v2514_v33 = vmul.f32 %v3467_v18, %v2506_v4 }
 0x5b3   : > { %v2510_v16 = vmul.f32 %v3469_v2, %v2502_v60 }
 0x5b4   : > { %v4804_v41 = vsel %vm1328_vm1, %v3896_v61, %v2514_v33  ;;  %v2483_v19 = vpop.permute.xlu1 %2482 }
 0x5b5   : > { %2530 = vst.msk [vmem:[%s3788_s28 + $0x20] sm:$0xff] %vm5144_vm9, %v4804_v41  ;;  %v4811_v35 = vsel %vm1328_vm1, %v3858_v43, %v2510_v16  ;;  %v2504_v44 = vadd.f32 %v2483_v19, %v3874_v52  ;;  %v2615_v19 = vmul.f32 (!%p2941_p1), %v4804_v41, %v4804_v41  ;;  %vm5160_vm9 = vcmask (!%p2941_p1), 1040384  }
 0x5b6   : > { %2526 = vst.msk [vmem:[%s3788_s28] sm:$0xff] %vm5145_vm10, %v4811_v35  ;;  %v2611_v18 = vmul.f32 (!%p2941_p1), %v4811_v35, %v4811_v35 }
 0x5b7   : > { %v2512_v51 = vmul.f32 %v3471_v59, %v2504_v44 }
 0x5b8   : > { %v2485_v61 = vpop.permute.xlu1 %2484 }
 0x5b9   : > { %v4819_v21 = vsel %vm1328_vm1, %v3874_v52, %v2512_v51  ;;  %v2505_v26 = vadd.f32 %v3864_v48, %v2485_v61  ;;  %v3593_v51 = vmov (!%p2941_p1), 0  }
 0x5ba   : > { %2528 = vst.msk [vmem:[%s3788_s28 + $0x10] sm:$0xff] %vm5146_vm15, %v4819_v21  ;;  %2492 = vrot.lane.b32.xlu1 %v4750_v46, %s3584_s18  ;;  %v2940_v46 = vmul.f32 -1.442695, %v4754_v10  ;;  %v2613_v60 = vmul.f32 (!%p2941_p1), %v4819_v21, %v4819_v21  ;;  %3484 = vset.pattern.permute.xlu0 (!%p2941_p1), %v3593_v51 }
 0x5bb   : > { %v2513_v43 = vmul.f32 %v3473_v3, %v2505_v26 }
 0x5bc   : > { %v2489_v12 = vpop.permute.xlu1 %2488  ;;  %3476 = vpow2.f32 %v2940_v46 }
 0x5bd   : > { %v2521_v37 = vsel %vm1328_vm1, %v3864_v48, %v2513_v43  ;;  %v2507_v13 = vadd.f32 %v3880_v57, %v2489_v12  ;;  %v2939_v48 = vmul.f32 -1.442695, %v4745_v7 }
 0x5be   : > { %2529 = vst.msk [vmem:[%s3788_s28 + $0x18] sm:$0xff] %vm5147_vm14, %v2521_v37  ;;  %v2614_v2 = vmul.f32 (!%p2941_p1), %v2521_v37, %v2521_v37 }
 0x5bf   : > { %v2515_v52 = vmul.f32 %v3475_v0, %v2507_v13  ;;  %3478 = vpow2.f32 %v2939_v48 }
 0x5c1   : > { %v4834_v58 = vsel %vm1328_vm1, %v3880_v57, %v2515_v52 }
 0x5c2   : > { %2531 = vst.msk [vmem:[%s3788_s28 + $0x28] sm:$0xff] %vm5148_vm5, %v4834_v58  ;;  %v2616_v59 = vmul.f32 (!%p2941_p1), %v4834_v58, %v4834_v58 }
 0x5c4   : > { %2490 = vrot.lane.b32.xlu0 %v4742_v50, %s3584_s18 }
 0x5c6   : > { %v3477_v55 = vpop.eup %3476 }
 0x5c7   : > { %v2365_v15 = vadd.f32 1.0, %v3477_v55 }
 0x5c9   : > { %v3479_v6 = vpop.eup %3478  ;;  %3480 = vrcp.f32 %v2365_v15 }
 0x5ca   : > { %v2364_v36 = vadd.f32 1.0, %v3479_v6 }
 0x5cc   : > { %3482 = vrcp.f32 %v2364_v36 }
 0x5d3   : > { %v3481_v47 = vpop.eup %3480 }
 0x5d6   : > { %v3483_v31 = vpop.eup %3482 }
 0x5ed   : > { %v2568_v28 = vpop.xlane.xlu0 %2567 }
 0x602   : > { %v2571_v56 = vpop.xlane.xlu1 %2570 }
 0x603   : > { %v2590_v57 = vadd.f32 %v2571_v56, %v2568_v28 }
 0x607   : > { %v2574_v30 = vpop.xlane.xlu0 %2573 }
 0x608   : > { %v2591_v34 = vadd.f32 %v2590_v57, %v2574_v30 }
 0x61e   : > { %v2577_v14 = vpop.xlane.xlu0 %2576 }
 0x61f   : > { %v2592_v24 = vadd.f32 %v2591_v34, %v2577_v14 }
 0x623   : > { %v2580_v62 = vpop.xlane.xlu1 %2579 }
 0x624   : > { %v2593_v10 = vadd.f32 %v2592_v24, %v2580_v62 }
 0x631   : > { %v2583_v50 = vpop.xlane.xlu0 %2582 }
 0x632   : > { %v2594_v7 = vadd.f32 %v2593_v10, %v2583_v50  ;;  %v2666_v50 = vsub.s32 (!%p2941_p1), 0, %v3849_v40 }
 0x636   : > { %v2586_v5 = vpop.xlane.xlu1 %2585 }
 0x637   : > { %v2595_v45 = vadd.f32 %v2594_v7, %v2586_v5 }
 0x63a   : > { %v2493_v23 = vpop.permute.xlu1 %2492 }
 0x63b   : > { %v2509_v27 = vadd.f32 %v3906_v1, %v2493_v23  ;;  %v2589_v25 = vpop.xlane.xlu0 %2588 }
 0x63c   : > { %v2596_v20 = vadd.f32 %v2595_v45, %v2589_v25 }
 0x63d   : > { %v2517_v38 = vmul.f32 %v3481_v47, %v2509_v27 }
 0x63e   : > { %v2597_v17 = vrot.slane %v2596_v20, 4 }
 0x63f   : > { %v2525_v54 = vsel %vm1328_vm1, %v3906_v1, %v2517_v38  ;;  %v2491_v22 = vpop.permute.xlu0 %2490 }
 0x640   : > { %2533 = vst.msk [vmem:[%s3788_s28 + $0x38] sm:$0xff] %vm5149_vm11, %v2525_v54  ;;  %v2598_v9 = vadd.f32 %v2597_v17, %v2596_v20  ;;  %v2508_v29 = vadd.f32 %v2491_v22, %v3920_v8  ;;  %v2618_v26 = vmul.f32 (!%p2941_p1), %v2525_v54, %v2525_v54 }
 0x642   : > { %v2599_v42 = vrot.slane %v2598_v9, 2  ;;  %v2516_v53 = vmul.f32 %v3483_v31, %v2508_v29 }
 0x644   : > { %v2600_v32 = vadd.f32 %v2599_v42, %v2598_v9  ;;  %v2524_v39 = vsel %vm1328_vm1, %v3920_v8, %v2516_v53  ;;  %v2612_v8 = vmul.f32 (!%p2941_p1), %v4795_v49, %v4795_v49  ;;  %vm5152_vm1 = vcmask (!%p2941_p1), 130048  }
 0x645   : > { %2532 = vst.msk [vmem:[%s3788_s28 + $0x30] sm:$0xff] %vm5150_vm0, %v2524_v39  ;;  %v2619_v33 = vsel (!%p2941_p1), %vm5152_vm1, %v2611_v18, 0.0  ;;  %vm5153_vm13 = vmmov (!%p2941_p1), %vm5152_vm1  ;;  %v2617_v21 = vmul.f32 (!%p2941_p1), %v2524_v39, %v2524_v39 }
 0x646   : > { %v2601_v4 = vrot.slane %v2600_v32, 1  ;;  %2610 = sbr.rel (%p2941_p1) target bundleno = 1784 (0x6f8), region = 68  ;;  %v2625_v16 = vsel (!%p2941_p1), %vm5153_vm13, %v2613_v60, 0.0  ;;  %2620 = vadd.xlane.f32.xlu0 (!%p2941_p1), %v2619_v33  ;;  %vm5154_vm8 = vmmov (!%p2941_p1), %vm5152_vm1 }
 0x647   : > { %2626 = vadd.xlane.f32.xlu1 (!%p2941_p1), %v2625_v16  ;;  %v2622_v44 = vsel (!%p2941_p1), %vm5154_vm8, %v2612_v8, 0.0  ;;  %vm5155_vm4 = vmmov (!%p2941_p1), %vm5152_vm1 }
 0x648   : > { %v2602_v11 = vadd.f32 %v2601_v4, %v2600_v32  ;;  %v2628_v35 = vsel (!%p2941_p1), %vm5155_vm4, %v2614_v2, 0.0  ;;  %vm5156_vm12 = vmmov (!%p2941_p1), %vm5152_vm1 }
 0x649   : > { %v2631_v49 = vsel (!%p2941_p1), %vm5156_vm12, %v2615_v19, 0.0  ;;  %vm5157_vm7 = vmmov (!%p2941_p1), %vm5152_vm1 }
 0x64a   : > { %v2604_v1 = vadd.f32 %v2603_v63, %v2602_v11  ;;  %2623 = vadd.xlane.f32.xlu0 (!%p2941_p1), %v2622_v44  ;;  %v2634_v61 = vsel (!%p2941_p1), %vm5157_vm7, %v2616_v59, 0.0  ;;  %vm5158_vm6 = vmmov (!%p2941_p1), %vm5152_vm1 }
 0x64b   : > { %2629 = vadd.xlane.f32.xlu1 (!%p2941_p1), %v2628_v35  ;;  %v2637_v41 = vsel (!%p2941_p1), %vm5158_vm6, %v2617_v21, 0.0  ;;  %vm5159_vm2 = vmmov (!%p2941_p1), %vm5152_vm1 }
 0x64c   : > { %2606 = vst.msk [vmem:[#allocation2] sm:$0x1] %vm2605_vm3, %v2604_v1  ;;  %v2640_v3 = vsel (!%p2941_p1), %vm5159_vm2, %v2618_v26, 0.0 }
 0x64e   : > { %2632 = vadd.xlane.f32.xlu0 %v2631_v49 }
 0x64f   : > { %2635 = vadd.xlane.f32.xlu1 %v2634_v61 }
 0x652   : > { %2638 = vadd.xlane.f32.xlu0 %v2637_v41 }
 0x653   : > { %2641 = vadd.xlane.f32.xlu1 %v2640_v3  ;;  %v2658_v43 = vld [vmem:[#allocation2] sm:$0x1] }
 0x668   : > { %2661 = vperm.xlu0 %3484, %v2658_v43  }
 0x6d3   : > { %v2621_v12 = vpop.xlane.xlu0 %2620 }
 0x6d4   : > { %v2627_v37 = vpop.xlane.xlu1 %2626 }
 0x6d7   : > { %v2624_v13 = vpop.xlane.xlu0 %2623 }
 0x6d8   : > { %v2630_v0 = vpop.xlane.xlu1 %2629  ;;  %v2643_v52 = vadd.f32 %v2624_v13, %v2621_v12 }
 0x6da   : > { %v2644_v58 = vadd.f32 %v2643_v52, %v2627_v37 }
 0x6db   : > { %v2633_v46 = vpop.xlane.xlu0 %2632 }
 0x6dc   : > { %v2636_v48 = vpop.xlane.xlu1 %2635  ;;  %v2645_v28 = vadd.f32 %v2644_v58, %v2630_v0 }
 0x6de   : > { %v2646_v55 = vadd.f32 %v2645_v28, %v2633_v46 }
 0x6df   : > { %v2639_v56 = vpop.xlane.xlu0 %2638 }
 0x6e0   : > { %v2647_v30 = vadd.f32 %v2646_v55, %v2636_v48  ;;  %v2642_v15 = vpop.xlane.xlu1 %2641 }
 0x6e2   : > { %v2648_v6 = vadd.f32 %v2647_v30, %v2639_v56 }
 0x6e4   : > { %v2649_v57 = vadd.f32 %v2648_v6, %v2642_v15 }
 0x6e6   : > { %v2650_v14 = vrot.slane %v2649_v57, 4 }
 0x6e7   : > { %v2662_v10 = vpop.permute.xlu0 %2661 }
 0x6e8   : > { %v2651_v34 = vadd.f32 %v2650_v14, %v2649_v57  ;;  %v2667_v45 = vrot.slane %v2662_v10, %v2666_v50 }
 0x6ea   : > { %v2652_v62 = vrot.slane %v2651_v34, 2 }
 0x6ec   : > { %v2653_v36 = vadd.f32 %v2652_v62, %v2651_v34 }
 0x6ee   : > { %v2654_v24 = vrot.slane %v2653_v36, 1 }
 0x6f0   : > { %v2655_v5 = vadd.f32 %v2654_v24, %v2653_v36 }
 0x6f2   : > { %v2656_v7 = vmul.f32 -0.5, %v2655_v5 }
 0x6f4   : > { %v2942_v23 = vadd.f32 -940.99304, %v2656_v7 }
 0x6f6   : > { %v2668_v27 = vsel %vm5160_vm9, %v2667_v45, %v2942_v23 }
 0x6f7   : > { %2669 = vst [vmem:[%s3781_s0] sm:$0x3] %v2668_v27 }
 0x6f8 PF: > { %s5161_s16 = sld [smem:[#allocation10_spill]]  ;;  %s5162_s13 = sld [smem:[#allocation7_spill]] }
 0x6f9   : > { %s5164_s25 = sld [smem:[#allocation21_spill]]  ;;  %s2688_s22 = sshll.u32 %s3788_s28, 4  ;;  %s4882_s22 = int_to_ptr.vmem [resolvable:$true] %s2688_s22 }
 0x6fa   : > { %s3485_s0 = scalar_lea.vmem %s4882_s22, 1024  ;;  %s3594_s17 = smov [#allocation3]  }
 0x6fb   : > { %p3486_p2 = scmp.ne.s32.totalorder %s4882_s22, %s3485_s0  ;;  %s3489_s30 = sshll.u32 %s3594_s17, 4  ;;  %s3490_s30 = int_to_ptr.vmem [resolvable:$false] %s3489_s30 }
 0x6fc   : > { %s3491_s23 = scalar_lea.vmem %s3490_s30, 2048  ;;  %p3492_p6 = scmp.lt.s32.totalorder %s4882_s22, %s3490_s30 }
 0x6fd   : > { %p3487_p4 = pnand %p3486_p2, %p3705_p3  ;;  %p3493_p7 = scmp.lt.s32.totalorder %s3491_s23, %s3485_s0 }
 0x6fe   : > { %s2951_s10 = sshll.u32 %s5161_s16, 10  ;;  %s5165_s19 = sand.u32 1, %s5162_s13  }
 0x6ff   : > { %s4879_s12 = scalar_lea.hbm %s5164_s25, %s2951_s10  ;;  %s4886_s3 = scalar_lea.sflag [#allocation4], %s5165_s19 }
 0x700   : > { %p3488_p5 = pneg %p3487_p4  ;;  %p3494_p8 = por %p3493_p7, %p3492_p6 }
 0x702   : > { %p3495_p10 = pnand %p3494_p8, %p3488_p5 }
 0x704   : > { %3498 = shalt.err (!%p3495_p10)
}
 0x705   : > { %s3499_s28 = scalar_lea.hbm %s4879_s12, 1024  ;;  %s3503_s14 = scalar_lea.hbm %s5164_s25, 2048 }
 0x706   : > { %p3500_p11 = scmp.ne.s32.totalorder %s4879_s12, %s3499_s28  ;;  %p3504_p0 = scmp.lt.u32.totalorder %s4879_s12, %s5164_s25 }
 0x707   : > { %p3505_p1 = scmp.lt.u32.totalorder %s3503_s14, %s3499_s28  ;;  %p3507_p4 = scmp.lt.u32.totalorder %s3499_s28, %s4879_s12 }
 0x708   : > { %p3501_p12 = pnand %p3500_p11, %p3705_p3 }
 0x709   : > { %p3506_p2 = por %p3505_p1, %p3504_p0 }
 0x70a   : > { %p3502_p13 = pneg %p3501_p12 }
 0x70b   : > { %p3508_p5 = por %p3507_p4, %p3506_p2 }
 0x70d   : > { %p3509_p6 = pnand %p3508_p5, %p3502_p13 }
 0x70f   : > { %3512 = shalt.err (!%p3509_p6)
}
 0x710   : > { %s3595_s16 = smov 128  }
 0x711   : > { %3215 = dma.vmem_to_hbm [thread:$0]  (%p3705_p3), %s4882_s22, 1024, %s4879_s12, %s4886_s3, %s3595_s16, %s3595_s16, %s3584_s18  }
 0x712 PF: > { %s5166_s13 = sld [smem:[#allocation13_spill]]  ;;  %s5167_s10 = sld [smem:[#allocation6_spill]] }
 0x718   : > { %p3221_p7 = scmp.ge.s32.totalorder %s5166_s13, 2  ;;  %s2706_s21 = sand.u32 1, %s5167_s10  }
 0x719   : > { %s2707_s19 = scalar_lea.sflag [#allocation4], %s2706_s21 }
 0x71a   : > { %p3218_p8 = pnand %p3221_p7, %p3715_p9 }
 0x71c   : > { %3546 = dma.done.wait (!%p3218_p8), %s2707_s19, 1024  }
 0x71d   : > { %3548 = vsyncadd (!%p3218_p8), %s2707_s19, 4294966272  ;;  %s25_s24 = sadd.s32 1, %s5166_s13   ;;  %s5169_s17 = sld [smem:[#allocation7_spill]] }
 0x71e   : > { %p22_p10 = scmp.ge.s32.totalorder %s25_s24, 6   ;;  %s5170_s18 = sld [smem:[#allocation8_spill]] }
 0x71f   : > { %s5171_s19 = sld [smem:[#allocation18_spill]]  ;;  %s5172_s20 = sld [smem:[#allocation11_spill]] }
 0x720   : > { %s5173_s21 = sld [smem:[#allocation12_spill]]  ;;  %s5174_s22 = sld [smem:[#allocation14_spill]] }
 0x721   : > { %s5175_s23 = sld [smem:[#allocation16_spill]]  ;;  %24 = sbr.rel (!%p22_p10) target bundleno = 9 (0x9), region = 142 }
 0x728   :  { %2719 = vsyncpa [#allocation4], 1 }
 0x729   :  { %2721 = vsyncpa [#allocation4 + $0x1], 1 }

</bundles_post_ra>
